<compile_context>
chip_gen: v6e
topology: v6e:2x2x1
jax: 0.10.0
libtpu: 0.0.40
codegen_flags: <defaults>
</compile_context>

<pallas_src>
import functools

import jax
import jax.numpy as jnp
from jax import lax
from jax.experimental import pallas as pl
from jax.experimental.pallas import tpu as pltpu


def _npa_kernel(x_ref, *rest, n_neighbors, n_layers, update_rate, n_steps):
    w_refs = rest[:n_layers]          # weights already transposed by the wrapper: [C_out, C_in]
    o_ref = rest[n_layers]

    N = x_ref.shape[0]
    f32 = jnp.float32
    bf16 = jnp.bfloat16

    # Transposed working state: channels on sublanes, nodes on lanes.
    xT0 = jnp.transpose(x_ref[...].astype(f32))                    # [C, N]
    # Weights hoisted out of the step loop, cast once to bf16 for the MXU.
    wTs = tuple(w[...].astype(bf16) for w in w_refs)               # [C_out, C_in]

    def step(xT):
        # ---- kNN ranking key (transposed): candidates j on sublanes, queries i on lanes ----
        x_nt = jnp.transpose(xT)                                   # [N, C] (aligned 8x64 vxpose)
        p = x_nt[:, 0:2]                                           # [N, 2] candidate positions
        pT = xT[0:2, :]                                            # [2, N] query positions
        sq = jnp.sum(p * p, axis=1, keepdims=True)                 # [N, 1] |p_j|^2
        # d2T[j, i] = -2 p_j.p_i + |p_j|^2  (query-constant |p_i|^2 dropped: rank-invariant)
        d2T = jnp.dot(p * (-2.0), pT, preferred_element_type=f32) + sq   # [N, N], canonical MXU

        # Index-epsilon tie-break along the candidate (sublane) axis; one VPU add.
        iotaT = lax.broadcasted_iota(jnp.int32, (N, N), 0).astype(f32)
        keyedT = d2T + iotaT * 1e-6

        # ---- iterative top-k: one cheap SUBLANE min-reduce per pick ----
        adjT = jnp.zeros((N, N), f32)                              # adjT[j, i] = 1 iff j in kNN(i)
        for _ in range(n_neighbors):
            col_min = jnp.min(keyedT, axis=0, keepdims=True)       # [1, N]
            onehot = keyedT == col_min
            adjT = adjT + onehot.astype(f32)
            keyedT = jnp.where(onehot, 1e30, keyedT)

        # ---- symmetric degree normalization (PyG GCNConv style) ----
        # Same in-degree vector for BOTH endpoints, computed from the actual adjacency
        # (exact ties may make a column pick > n_neighbors, so never assume deg == k).
        deg = jnp.sum(adjT, axis=0, keepdims=True)                 # [1, N] in-degree per node
        inv = lax.rsqrt(jnp.maximum(deg, 1.0))                     # [1, N] deg^{-1/2}
        adjT_bf = adjT.astype(bf16)

        # ---- GCN layers, transposed layout: h_i <- deg_i^{-1/2} sum_j A_ij deg_j^{-1/2} (W h_j)
        hT = xT
        for li, wT in enumerate(wTs):
            src = (hT * inv).astype(bf16)                          # source-side deg_j^{-1/2}
            gT = jnp.dot(wT, src, preferred_element_type=f32)      # feature transform  [C_out, N]
            hT = jnp.dot(gT.astype(bf16), adjT_bf,
                         preferred_element_type=f32) * inv         # aggregate + deg_i^{-1/2}
            if li < n_layers - 1:
                hT = jnp.maximum(hT, 0.0)                          # ReLU between layers

        return xT + update_rate * hT

    if n_steps <= 4:
        xT = xT0
        for _ in range(n_steps):
            xT = step(xT)
    else:
        # Serially-dependent steps: plain fori_loop with a manually 2x-unrolled body.
        n_pairs, rem = divmod(n_steps, 2)
        xT = lax.fori_loop(0, n_pairs, lambda _, s: step(step(s)), xT0)
        if rem:
            xT = step(xT)

    o_ref[...] = jnp.transpose(xT).astype(o_ref.dtype)


def npa_forward(seed, weights, *, n_neighbors=9, n_layers=4,
                update_rate=1e-4, n_steps=1):
    """seed: [N, C] float32 particle state (positions in x[:, :2]);
    weights: list of n_layers (C_in, C_out) matrices (GCN layers, no bias)."""
    N, C = seed.shape
    assert len(weights) == n_layers, "expected exactly one weight matrix per GCN layer"

    # Pre-transpose weights on the host/XLA side so the kernel's transposed-layout
    # GCN uses only canonical MXU matmuls (no in-kernel weight transposes).
    weights_t = [jnp.transpose(w) for w in weights]                # [C_out, C_in]

    kernel = functools.partial(
        _npa_kernel,
        n_neighbors=n_neighbors,
        n_layers=n_layers,
        update_rate=update_rate,
        n_steps=n_steps,
    )
    in_specs = [pl.BlockSpec(seed.shape, lambda i: (0, 0))]
    in_specs += [pl.BlockSpec(w.shape, lambda i: (0, 0)) for w in weights_t]

    return pl.pallas_call(
        kernel,
        out_shape=jax.ShapeDtypeStruct((N, C), seed.dtype),
        grid=(1,),
        in_specs=in_specs,
        out_specs=pl.BlockSpec((N, C), lambda i: (0, 0)),
        compiler_params=pltpu.CompilerParams(
            dimension_semantics=("arbitrary",)),
    )(seed, *weights_t)


def init_weights(key, in_channels, hidden_scale=2, n_layers=4):
    """GCN(in, *(in*hidden_scale,)*(n_layers-1), in, bias=False) weight shapes."""
    hidden = in_channels * hidden_scale
    dims = [in_channels] + [hidden] * (n_layers - 1) + [in_channels]
    ws = []
    for i in range(n_layers):
        key, sub = jax.random.split(key)
        ws.append(jax.random.normal(sub, (dims[i], dims[i + 1]), jnp.float32)
                  / jnp.sqrt(jnp.float32(dims[i])))
    return ws


if __name__ == "__main__":
    key = jax.random.PRNGKey(0)
    k_seed, k_w = jax.random.split(key)

    N, C = 64, 8                       # 64 particles, 8 channels (x[:, :2] = positions)
    seed = jax.random.normal(k_seed, (N, C), jnp.float32)
    weights = init_weights(k_w, C, hidden_scale=2, n_layers=4)

    out = npa_forward(seed, weights, n_neighbors=9, n_layers=4,
                      update_rate=1e-4, n_steps=1)
    out = jax.block_until_ready(out)

    assert out.shape == (N, C) and out.dtype == jnp.float32
    assert bool(jnp.all(jnp.isfinite(out)))
    print("KERNEL_OK")
</pallas_src>

<mosaic_0001>
module attributes {stable_mosaic.version = 11 : i64} {
  func.func @_npa_kernel(%arg0: i32, %arg1: memref<64x8xf32, #tpu.memory_space<vmem>>, %arg2: memref<16x8xf32, #tpu.memory_space<vmem>>, %arg3: memref<16x16xf32, #tpu.memory_space<vmem>>, %arg4: memref<16x16xf32, #tpu.memory_space<vmem>>, %arg5: memref<8x16xf32, #tpu.memory_space<vmem>>, %arg6: memref<64x8xf32, #tpu.memory_space<vmem>>) attributes {dimension_semantics = [#tpu.dimension_semantics<arbitrary>], iteration_bounds = array<i64: 1>, scalar_prefetch = 0 : i64, scratch_operands = 0 : i64, tpu.core_type = #tpu.core_type<tc>, window_params = [{pipeline_mode = #tpu.pipeline_mode<synchronous>, transform_indices = @transform_0, window_bounds = array<i64: 64, 8>}, {pipeline_mode = #tpu.pipeline_mode<synchronous>, transform_indices = @transform_1, window_bounds = array<i64: 16, 8>}, {pipeline_mode = #tpu.pipeline_mode<synchronous>, transform_indices = @transform_2, window_bounds = array<i64: 16, 16>}, {pipeline_mode = #tpu.pipeline_mode<synchronous>, transform_indices = @transform_3, window_bounds = array<i64: 16, 16>}, {pipeline_mode = #tpu.pipeline_mode<synchronous>, transform_indices = @transform_4, window_bounds = array<i64: 8, 16>}, {pipeline_mode = #tpu.pipeline_mode<synchronous>, transform_indices = @transform_5, window_bounds = array<i64: 64, 8>}]} {
    %c0 = arith.constant 0 : index
    %c0_0 = arith.constant 0 : index
    %0 = vector.load %arg1[%c0, %c0_0] : memref<64x8xf32, #tpu.memory_space<vmem>>, vector<64x8xf32>
    %1 = tpu.transpose %0, [1, 0] : vector<64x8xf32> -> vector<8x64xf32>
    %c0_1 = arith.constant 0 : index
    %c0_2 = arith.constant 0 : index
    %2 = vector.load %arg2[%c0_1, %c0_2] : memref<16x8xf32, #tpu.memory_space<vmem>>, vector<16x8xf32>
    %3 = arith.truncf %2 : vector<16x8xf32> to vector<16x8xbf16>
    %c0_3 = arith.constant 0 : index
    %c0_4 = arith.constant 0 : index
    %4 = vector.load %arg3[%c0_3, %c0_4] : memref<16x16xf32, #tpu.memory_space<vmem>>, vector<16x16xf32>
    %5 = arith.truncf %4 : vector<16x16xf32> to vector<16x16xbf16>
    %c0_5 = arith.constant 0 : index
    %c0_6 = arith.constant 0 : index
    %6 = vector.load %arg4[%c0_5, %c0_6] : memref<16x16xf32, #tpu.memory_space<vmem>>, vector<16x16xf32>
    %7 = arith.truncf %6 : vector<16x16xf32> to vector<16x16xbf16>
    %c0_7 = arith.constant 0 : index
    %c0_8 = arith.constant 0 : index
    %8 = vector.load %arg5[%c0_7, %c0_8] : memref<8x16xf32, #tpu.memory_space<vmem>>, vector<8x16xf32>
    %9 = arith.truncf %8 : vector<8x16xf32> to vector<8x16xbf16>
    %10 = tpu.transpose %1, [1, 0] : vector<8x64xf32> -> vector<64x8xf32>
    %11 = vector.extract_strided_slice %10 {offsets = [0, 0], sizes = [64, 2], strides = [1, 1]} : vector<64x8xf32> to vector<64x2xf32>
    %12 = vector.extract_strided_slice %1 {offsets = [0, 0], sizes = [2, 64], strides = [1, 1]} : vector<8x64xf32> to vector<2x64xf32>
    %13 = arith.mulf %11, %11 : vector<64x2xf32>
    %cst = arith.constant dense<0.000000e+00> : vector<64xf32>
    %14 = vector.multi_reduction <add>, %13, %cst [1] : vector<64x2xf32> to vector<64xf32>
    %15 = vector.shape_cast %14 : vector<64xf32> to vector<64x1xf32>
    %cst_9 = arith.constant -2.000000e+00 : f32
    %16 = vector.broadcast %cst_9 : f32 to vector<64x2xf32>
    %17 = arith.mulf %11, %16 : vector<64x2xf32>
    %cst_10 = arith.constant dense<0.000000e+00> : vector<64x64xf32>
    %18 = tpu.matmul %17, %12, %cst_10 {dimension_numbers = #tpu.dot_dimension_numbers<[1], [0], [0], [1], [0, 0, 1, 1], [], []>} : vector<64x2xf32>, vector<2x64xf32>, vector<64x64xf32> -> vector<64x64xf32>
    %19 = vector.broadcast %15 : vector<64x1xf32> to vector<64x64xf32>
    %20 = arith.addf %18, %19 : vector<64x64xf32>
    %21 = tpu.iota {dimensions = array<i32: 0>} : vector<64x64xi32>
    %22 = arith.sitofp %21 : vector<64x64xi32> to vector<64x64xf32>
    %cst_11 = arith.constant 9.99999997E-7 : f32
    %23 = vector.broadcast %cst_11 : f32 to vector<64x64xf32>
    %24 = arith.mulf %22, %23 : vector<64x64xf32>
    %25 = arith.addf %20, %24 : vector<64x64xf32>
    %cst_12 = arith.constant 0.000000e+00 : f32
    %26 = vector.broadcast %cst_12 : f32 to vector<64x64xf32>
    %cst_13 = arith.constant dense<0x7F800000> : vector<64xf32>
    %27 = vector.multi_reduction <minimumf>, %25, %cst_13 [0] : vector<64x64xf32> to vector<64xf32>
    %28 = vector.shape_cast %27 : vector<64xf32> to vector<1x64xf32>
    %29 = vector.broadcast %28 : vector<1x64xf32> to vector<64x64xf32>
    %30 = arith.cmpf oeq, %25, %29 : vector<64x64xf32>
    %31 = arith.extui %30 : vector<64x64xi1> to vector<64x64xi32>
    %32 = arith.sitofp %31 : vector<64x64xi32> to vector<64x64xf32>
    %33 = arith.addf %26, %32 : vector<64x64xf32>
    %cst_14 = arith.constant 1.000000e+30 : f32
    %34 = vector.broadcast %cst_14 : f32 to vector<64x64xf32>
    %35 = arith.select %30, %34, %25 : vector<64x64xi1>, vector<64x64xf32>
    %cst_15 = arith.constant dense<0x7F800000> : vector<64xf32>
    %36 = vector.multi_reduction <minimumf>, %35, %cst_15 [0] : vector<64x64xf32> to vector<64xf32>
    %37 = vector.shape_cast %36 : vector<64xf32> to vector<1x64xf32>
    %38 = vector.broadcast %37 : vector<1x64xf32> to vector<64x64xf32>
    %39 = arith.cmpf oeq, %35, %38 : vector<64x64xf32>
    %40 = arith.extui %39 : vector<64x64xi1> to vector<64x64xi32>
    %41 = arith.sitofp %40 : vector<64x64xi32> to vector<64x64xf32>
    %42 = arith.addf %33, %41 : vector<64x64xf32>
    %cst_16 = arith.constant 1.000000e+30 : f32
    %43 = vector.broadcast %cst_16 : f32 to vector<64x64xf32>
    %44 = arith.select %39, %43, %35 : vector<64x64xi1>, vector<64x64xf32>
    %cst_17 = arith.constant dense<0x7F800000> : vector<64xf32>
    %45 = vector.multi_reduction <minimumf>, %44, %cst_17 [0] : vector<64x64xf32> to vector<64xf32>
    %46 = vector.shape_cast %45 : vector<64xf32> to vector<1x64xf32>
    %47 = vector.broadcast %46 : vector<1x64xf32> to vector<64x64xf32>
    %48 = arith.cmpf oeq, %44, %47 : vector<64x64xf32>
    %49 = arith.extui %48 : vector<64x64xi1> to vector<64x64xi32>
    %50 = arith.sitofp %49 : vector<64x64xi32> to vector<64x64xf32>
    %51 = arith.addf %42, %50 : vector<64x64xf32>
    %cst_18 = arith.constant 1.000000e+30 : f32
    %52 = vector.broadcast %cst_18 : f32 to vector<64x64xf32>
    %53 = arith.select %48, %52, %44 : vector<64x64xi1>, vector<64x64xf32>
    %cst_19 = arith.constant dense<0x7F800000> : vector<64xf32>
    %54 = vector.multi_reduction <minimumf>, %53, %cst_19 [0] : vector<64x64xf32> to vector<64xf32>
    %55 = vector.shape_cast %54 : vector<64xf32> to vector<1x64xf32>
    %56 = vector.broadcast %55 : vector<1x64xf32> to vector<64x64xf32>
    %57 = arith.cmpf oeq, %53, %56 : vector<64x64xf32>
    %58 = arith.extui %57 : vector<64x64xi1> to vector<64x64xi32>
    %59 = arith.sitofp %58 : vector<64x64xi32> to vector<64x64xf32>
    %60 = arith.addf %51, %59 : vector<64x64xf32>
    %cst_20 = arith.constant 1.000000e+30 : f32
    %61 = vector.broadcast %cst_20 : f32 to vector<64x64xf32>
    %62 = arith.select %57, %61, %53 : vector<64x64xi1>, vector<64x64xf32>
    %cst_21 = arith.constant dense<0x7F800000> : vector<64xf32>
    %63 = vector.multi_reduction <minimumf>, %62, %cst_21 [0] : vector<64x64xf32> to vector<64xf32>
    %64 = vector.shape_cast %63 : vector<64xf32> to vector<1x64xf32>
    %65 = vector.broadcast %64 : vector<1x64xf32> to vector<64x64xf32>
    %66 = arith.cmpf oeq, %62, %65 : vector<64x64xf32>
    %67 = arith.extui %66 : vector<64x64xi1> to vector<64x64xi32>
    %68 = arith.sitofp %67 : vector<64x64xi32> to vector<64x64xf32>
    %69 = arith.addf %60, %68 : vector<64x64xf32>
    %cst_22 = arith.constant 1.000000e+30 : f32
    %70 = vector.broadcast %cst_22 : f32 to vector<64x64xf32>
    %71 = arith.select %66, %70, %62 : vector<64x64xi1>, vector<64x64xf32>
    %cst_23 = arith.constant dense<0x7F800000> : vector<64xf32>
    %72 = vector.multi_reduction <minimumf>, %71, %cst_23 [0] : vector<64x64xf32> to vector<64xf32>
    %73 = vector.shape_cast %72 : vector<64xf32> to vector<1x64xf32>
    %74 = vector.broadcast %73 : vector<1x64xf32> to vector<64x64xf32>
    %75 = arith.cmpf oeq, %71, %74 : vector<64x64xf32>
    %76 = arith.extui %75 : vector<64x64xi1> to vector<64x64xi32>
    %77 = arith.sitofp %76 : vector<64x64xi32> to vector<64x64xf32>
    %78 = arith.addf %69, %77 : vector<64x64xf32>
    %cst_24 = arith.constant 1.000000e+30 : f32
    %79 = vector.broadcast %cst_24 : f32 to vector<64x64xf32>
    %80 = arith.select %75, %79, %71 : vector<64x64xi1>, vector<64x64xf32>
    %cst_25 = arith.constant dense<0x7F800000> : vector<64xf32>
    %81 = vector.multi_reduction <minimumf>, %80, %cst_25 [0] : vector<64x64xf32> to vector<64xf32>
    %82 = vector.shape_cast %81 : vector<64xf32> to vector<1x64xf32>
    %83 = vector.broadcast %82 : vector<1x64xf32> to vector<64x64xf32>
    %84 = arith.cmpf oeq, %80, %83 : vector<64x64xf32>
    %85 = arith.extui %84 : vector<64x64xi1> to vector<64x64xi32>
    %86 = arith.sitofp %85 : vector<64x64xi32> to vector<64x64xf32>
    %87 = arith.addf %78, %86 : vector<64x64xf32>
    %cst_26 = arith.constant 1.000000e+30 : f32
    %88 = vector.broadcast %cst_26 : f32 to vector<64x64xf32>
    %89 = arith.select %84, %88, %80 : vector<64x64xi1>, vector<64x64xf32>
    %cst_27 = arith.constant dense<0x7F800000> : vector<64xf32>
    %90 = vector.multi_reduction <minimumf>, %89, %cst_27 [0] : vector<64x64xf32> to vector<64xf32>
    %91 = vector.shape_cast %90 : vector<64xf32> to vector<1x64xf32>
    %92 = vector.broadcast %91 : vector<1x64xf32> to vector<64x64xf32>
    %93 = arith.cmpf oeq, %89, %92 : vector<64x64xf32>
    %94 = arith.extui %93 : vector<64x64xi1> to vector<64x64xi32>
    %95 = arith.sitofp %94 : vector<64x64xi32> to vector<64x64xf32>
    %96 = arith.addf %87, %95 : vector<64x64xf32>
    %cst_28 = arith.constant 1.000000e+30 : f32
    %97 = vector.broadcast %cst_28 : f32 to vector<64x64xf32>
    %98 = arith.select %93, %97, %89 : vector<64x64xi1>, vector<64x64xf32>
    %cst_29 = arith.constant dense<0x7F800000> : vector<64xf32>
    %99 = vector.multi_reduction <minimumf>, %98, %cst_29 [0] : vector<64x64xf32> to vector<64xf32>
    %100 = vector.shape_cast %99 : vector<64xf32> to vector<1x64xf32>
    %101 = vector.broadcast %100 : vector<1x64xf32> to vector<64x64xf32>
    %102 = arith.cmpf oeq, %98, %101 : vector<64x64xf32>
    %103 = arith.extui %102 : vector<64x64xi1> to vector<64x64xi32>
    %104 = arith.sitofp %103 : vector<64x64xi32> to vector<64x64xf32>
    %105 = arith.addf %96, %104 : vector<64x64xf32>
    %cst_30 = arith.constant dense<0.000000e+00> : vector<64xf32>
    %106 = vector.multi_reduction <add>, %105, %cst_30 [0] : vector<64x64xf32> to vector<64xf32>
    %107 = vector.shape_cast %106 : vector<64xf32> to vector<1x64xf32>
    %cst_31 = arith.constant 1.000000e+00 : f32
    %108 = vector.broadcast %cst_31 : f32 to vector<1x64xf32>
    %109 = arith.maximumf %107, %108 : vector<1x64xf32>
    %110 = math.rsqrt %109 : vector<1x64xf32>
    %111 = arith.truncf %105 : vector<64x64xf32> to vector<64x64xbf16>
    %112 = vector.broadcast %110 : vector<1x64xf32> to vector<8x64xf32>
    %113 = arith.mulf %1, %112 : vector<8x64xf32>
    %114 = arith.truncf %113 : vector<8x64xf32> to vector<8x64xbf16>
    %cst_32 = arith.constant dense<0.000000e+00> : vector<16x64xf32>
    %115 = tpu.matmul %3, %114, %cst_32 {dimension_numbers = #tpu.dot_dimension_numbers<[1], [0], [0], [1], [0, 0, 1, 1], [], []>} : vector<16x8xbf16>, vector<8x64xbf16>, vector<16x64xf32> -> vector<16x64xf32>
    %116 = arith.truncf %115 : vector<16x64xf32> to vector<16x64xbf16>
    %cst_33 = arith.constant dense<0.000000e+00> : vector<16x64xf32>
    %117 = tpu.matmul %116, %111, %cst_33 {dimension_numbers = #tpu.dot_dimension_numbers<[1], [0], [0], [1], [0, 0, 1, 1], [], []>} : vector<16x64xbf16>, vector<64x64xbf16>, vector<16x64xf32> -> vector<16x64xf32>
    %118 = vector.broadcast %110 : vector<1x64xf32> to vector<16x64xf32>
    %119 = arith.mulf %117, %118 : vector<16x64xf32>
    %cst_34 = arith.constant 0.000000e+00 : f32
    %120 = vector.broadcast %cst_34 : f32 to vector<16x64xf32>
    %121 = arith.maximumf %119, %120 : vector<16x64xf32>
    %122 = vector.broadcast %110 : vector<1x64xf32> to vector<16x64xf32>
    %123 = arith.mulf %121, %122 : vector<16x64xf32>
    %124 = arith.truncf %123 : vector<16x64xf32> to vector<16x64xbf16>
    %cst_35 = arith.constant dense<0.000000e+00> : vector<16x64xf32>
    %125 = tpu.matmul %5, %124, %cst_35 {dimension_numbers = #tpu.dot_dimension_numbers<[1], [0], [0], [1], [0, 0, 1, 1], [], []>} : vector<16x16xbf16>, vector<16x64xbf16>, vector<16x64xf32> -> vector<16x64xf32>
    %126 = arith.truncf %125 : vector<16x64xf32> to vector<16x64xbf16>
    %cst_36 = arith.constant dense<0.000000e+00> : vector<16x64xf32>
    %127 = tpu.matmul %126, %111, %cst_36 {dimension_numbers = #tpu.dot_dimension_numbers<[1], [0], [0], [1], [0, 0, 1, 1], [], []>} : vector<16x64xbf16>, vector<64x64xbf16>, vector<16x64xf32> -> vector<16x64xf32>
    %128 = vector.broadcast %110 : vector<1x64xf32> to vector<16x64xf32>
    %129 = arith.mulf %127, %128 : vector<16x64xf32>
    %cst_37 = arith.constant 0.000000e+00 : f32
    %130 = vector.broadcast %cst_37 : f32 to vector<16x64xf32>
    %131 = arith.maximumf %129, %130 : vector<16x64xf32>
    %132 = vector.broadcast %110 : vector<1x64xf32> to vector<16x64xf32>
    %133 = arith.mulf %131, %132 : vector<16x64xf32>
    %134 = arith.truncf %133 : vector<16x64xf32> to vector<16x64xbf16>
    %cst_38 = arith.constant dense<0.000000e+00> : vector<16x64xf32>
    %135 = tpu.matmul %7, %134, %cst_38 {dimension_numbers = #tpu.dot_dimension_numbers<[1], [0], [0], [1], [0, 0, 1, 1], [], []>} : vector<16x16xbf16>, vector<16x64xbf16>, vector<16x64xf32> -> vector<16x64xf32>
    %136 = arith.truncf %135 : vector<16x64xf32> to vector<16x64xbf16>
    %cst_39 = arith.constant dense<0.000000e+00> : vector<16x64xf32>
    %137 = tpu.matmul %136, %111, %cst_39 {dimension_numbers = #tpu.dot_dimension_numbers<[1], [0], [0], [1], [0, 0, 1, 1], [], []>} : vector<16x64xbf16>, vector<64x64xbf16>, vector<16x64xf32> -> vector<16x64xf32>
    %138 = vector.broadcast %110 : vector<1x64xf32> to vector<16x64xf32>
    %139 = arith.mulf %137, %138 : vector<16x64xf32>
    %cst_40 = arith.constant 0.000000e+00 : f32
    %140 = vector.broadcast %cst_40 : f32 to vector<16x64xf32>
    %141 = arith.maximumf %139, %140 : vector<16x64xf32>
    %142 = vector.broadcast %110 : vector<1x64xf32> to vector<16x64xf32>
    %143 = arith.mulf %141, %142 : vector<16x64xf32>
    %144 = arith.truncf %143 : vector<16x64xf32> to vector<16x64xbf16>
    %cst_41 = arith.constant dense<0.000000e+00> : vector<8x64xf32>
    %145 = tpu.matmul %9, %144, %cst_41 {dimension_numbers = #tpu.dot_dimension_numbers<[1], [0], [0], [1], [0, 0, 1, 1], [], []>} : vector<8x16xbf16>, vector<16x64xbf16>, vector<8x64xf32> -> vector<8x64xf32>
    %146 = arith.truncf %145 : vector<8x64xf32> to vector<8x64xbf16>
    %cst_42 = arith.constant dense<0.000000e+00> : vector<8x64xf32>
    %147 = tpu.matmul %146, %111, %cst_42 {dimension_numbers = #tpu.dot_dimension_numbers<[1], [0], [0], [1], [0, 0, 1, 1], [], []>} : vector<8x64xbf16>, vector<64x64xbf16>, vector<8x64xf32> -> vector<8x64xf32>
    %148 = vector.broadcast %110 : vector<1x64xf32> to vector<8x64xf32>
    %149 = arith.mulf %147, %148 : vector<8x64xf32>
    %cst_43 = arith.constant 9.99999974E-5 : f32
    %150 = vector.broadcast %cst_43 : f32 to vector<8x64xf32>
    %151 = arith.mulf %150, %149 : vector<8x64xf32>
    %152 = arith.addf %1, %151 : vector<8x64xf32>
    %153 = tpu.transpose %152, [1, 0] : vector<8x64xf32> -> vector<64x8xf32>
    %c0_44 = arith.constant 0 : index
    %c0_45 = arith.constant 0 : index
    %154 = vector.load %arg6[%c0_44, %c0_45] : memref<64x8xf32, #tpu.memory_space<vmem>>, vector<64x8xf32>
    tpu.vector_store %arg6[%c0_44, %c0_45], %153 {strides = array<i32>} : memref<64x8xf32, #tpu.memory_space<vmem>>, vector<64x8xf32>,
    return
  }
  func.func @transform_0(%arg0: i32) -> (i32, i32) {
    %c0_i32 = arith.constant 0 : i32
    %c0_i32_0 = arith.constant 0 : i32
    %c0_i32_1 = arith.constant 0 : i32
    return %c0_i32, %c0_i32_0 : i32, i32
  }
  func.func @transform_1(%arg0: i32) -> (i32, i32) {
    %c0_i32 = arith.constant 0 : i32
    %c0_i32_0 = arith.constant 0 : i32
    %c0_i32_1 = arith.constant 0 : i32
    return %c0_i32, %c0_i32_0 : i32, i32
  }
  func.func @transform_2(%arg0: i32) -> (i32, i32) {
    %c0_i32 = arith.constant 0 : i32
    %c0_i32_0 = arith.constant 0 : i32
    %c0_i32_1 = arith.constant 0 : i32
    return %c0_i32, %c0_i32_0 : i32, i32
  }
  func.func @transform_3(%arg0: i32) -> (i32, i32) {
    %c0_i32 = arith.constant 0 : i32
    %c0_i32_0 = arith.constant 0 : i32
    %c0_i32_1 = arith.constant 0 : i32
    return %c0_i32, %c0_i32_0 : i32, i32
  }
  func.func @transform_4(%arg0: i32) -> (i32, i32) {
    %c0_i32 = arith.constant 0 : i32
    %c0_i32_0 = arith.constant 0 : i32
    %c0_i32_1 = arith.constant 0 : i32
    return %c0_i32, %c0_i32_0 : i32, i32
  }
  func.func @transform_5(%arg0: i32) -> (i32, i32) {
    %c0_i32 = arith.constant 0 : i32
    %c0_i32_0 = arith.constant 0 : i32
    %c0_i32_1 = arith.constant 0 : i32
    return %c0_i32, %c0_i32_0 : i32, i32
  }
}

</mosaic_0001>

<bundles_post_ra>
// kernel: tpu_custom_call.1
= control target key start
LH: loop header
LB: loop body
LE: loop exit
PB: predicated region body
PF: predicated region fallthrough
CT: control target
= control target key end

     0   :  { %vm169_vm0 = vcmask 1041408   ;;  %vm112_vm1 = vcmask 15360   ;;  %v1526_v41 = vmov 0.0   ;;  %v278_v43 = vlaneseq  ;;  %s2550_s0 = inlined_call_operand.vmem [shape: f32[64,8], index: 0, kind: input, shape index: {}]   ;;  %s2551_s1 = inlined_call_operand.vmem [shape: f32[16,8], index: 1, kind: input, shape index: {}]   ;;  %s2552_s2 = inlined_call_operand.vmem [shape: f32[16,16], index: 2, kind: input, shape index: {}]   ;;  %s2553_s3 = inlined_call_operand.vmem [shape: f32[16,16], index: 3, kind: input, shape index: {}]   ;;  %s2554_s4 = inlined_call_operand.vmem [shape: f32[8,16], index: 4, kind: input, shape index: {}]   ;;  %s2555_s5 = inlined_call_operand.vmem [shape: f32[64,8], index: 5, kind: output, shape index: {}]  }
   0x1   :  { %v21_v0 = vld [vmem:[%s2550_s0] sm:$0xff]  ;;  %v22_v1 = vld [vmem:[%s2550_s0 + $0x8] sm:$0xff]  ;;  %v23_v2 = vld [vmem:[%s2550_s0 + $0x10] sm:$0xff]  ;;  %1450 = vmatprep.subr.bf16.mxu1 %v1526_v41  ;;  %vm311_vm2 = vcmask 523264  }
   0x2   :  { %29 = vxpose.xlu0.b32.start [1/8] (short) (narrow) %v21_v0, 8  ;;  %v24_v3 = vld [vmem:[%s2550_s0 + $0x18] sm:$0xff]  ;;  %v25_v4 = vld [vmem:[%s2550_s0 + $0x20] sm:$0xff]  ;;  %v26_v5 = vld [vmem:[%s2550_s0 + $0x28] sm:$0xff]  ;;  %v279_v46 = vshrl.u32 %v278_v43, 7 }
   0x3   :  { %v27_v6 = vld [vmem:[%s2550_s0 + $0x30] sm:$0xff]  ;;  %v28_v7 = vld [vmem:[%s2550_s0 + $0x38] sm:$0xff] }
   0x4   :  { %v283_v49 = vadd.s32 32, %v279_v46  ;;  %v284_v50 = vadd.s32 40, %v279_v46  ;;  %v280_v52 = vadd.s32 8, %v279_v46  ;;  %v282_v53 = vadd.s32 24, %v279_v46 }
   0x5   :  { %v281_v55 = vadd.s32 16, %v279_v46  ;;  %v286_v57 = vadd.s32 56, %v279_v46  ;;  %v287_v59 = vcvt.s32.f32 %v279_v46  ;;  %v285_v62 = vadd.s32 48, %v279_v46 }
   0x6   :  { %30 = vxpose.xlu0.b32.cont [2/8] (short) (narrow) %v22_v1, 8  ;;  %v291_v56 = vcvt.s32.f32 %v283_v49  ;;  %v292_v61 = vcvt.s32.f32 %v284_v50  ;;  %v288_v0 = vcvt.s32.f32 %v280_v52  ;;  %v290_v1 = vcvt.s32.f32 %v282_v53 }
   0xa   :  { %31 = vxpose.xlu0.b32.cont [3/8] (short) (narrow) %v23_v2, 8 }
   0xe   :  { %32 = vxpose.xlu0.b32.cont [4/8] (short) (narrow) %v24_v3, 8  ;;  %v289_v3 = vcvt.s32.f32 %v281_v55 }
  0x12   :  { %33 = vxpose.xlu0.b32.cont [5/8] (short) (narrow) %v25_v4, 8 }
  0x16   :  { %34 = vxpose.xlu0.b32.cont [6/8] (short) (narrow) %v26_v5, 8  ;;  %v299_v5 = vmul.f32 1e-06, %v291_v56 }
  0x1a   :  { %35 = vxpose.xlu0.b32.cont [7/8] (short) (narrow) %v27_v6, 8  ;;  %v294_v6 = vcvt.s32.f32 %v286_v57 }
  0x1e   :  { %36 = vxpose.xlu0.b32.end [8/8] (short) (narrow) %v28_v7, 8 }
  0x7e   :  { %v1582_v8 = vpop.trf.xlu0 }
  0x7f   :  { %1436 = vmatprep.subr.msk.mxu0 %vm169_vm0, %v1582_v8  ;;  %72 = vxpose.xlu1.b32.start.end [1/1] (short) (narrow) %v1582_v8, 64 }
  0x80   :  { %1437 = vmatpush3.msk.msra.mxu0 %vm169_vm0, %v1582_v8 }
  0x81   :  { %1456 = vmatprep.subr.bf16.mxu0 %v1526_v41 }
  0xfb   :  { %v88_v9 = vpop.trf.xlu1 }
  0xfc   :  { %v104_v10 = vmul.f32 %v88_v9, %v88_v9  ;;  %v137_v11 = vmul.f32 -2.0, %v88_v9  ;;  %v295_v9 = vmul.f32 1e-06, %v287_v59 }
  0xfe   :  { %1438 = vmatprep.mubr.msk.f32.mxu0 %vm112_vm1, %v137_v11  ;;  %v113_v12 = vsel %vm112_vm1, %v104_v10, 0.0 }
  0xff   :  { %114 = vadd.xlane.f32.xlu1 %v113_v12  ;;  %v89_v13 = vpop.trf.xlu1  ;;  %v300_v12 = vmul.f32 1e-06, %v292_v61 }
 0x100   :  { %v105_v14 = vmul.f32 %v89_v13, %v89_v13  ;;  %v138_v15 = vmul.f32 -2.0, %v89_v13  ;;  %v293_v13 = vcvt.s32.f32 %v285_v62 }
 0x102   :  { %1439 = vmatmul.mubr.msk.f32.vlgmr.msra.gmra.mxu0 %vm112_vm1, %v138_v15  ;;  %v116_v16 = vsel %vm112_vm1, %v105_v14, 0.0  ;;  %v296_v15 = vmul.f32 1e-06, %v288_v0 }
 0x103   :  { %117 = vadd.xlane.f32.xlu0 %v116_v16  ;;  %v90_v17 = vpop.trf.xlu1 }
 0x104   :  { %v106_v18 = vmul.f32 %v90_v17, %v90_v17  ;;  %v139_v19 = vmul.f32 -2.0, %v90_v17  ;;  %v298_v17 = vmul.f32 1e-06, %v290_v1 }
 0x106   :  { %1441 = vmatprep.mubr.msk.f32.mxu0 %vm112_vm1, %v139_v19  ;;  %v119_v20 = vsel %vm112_vm1, %v106_v18, 0.0  ;;  %v297_v19 = vmul.f32 1e-06, %v289_v3 }
 0x107   :  { %120 = vadd.xlane.f32.xlu1 %v119_v20  ;;  %v91_v21 = vpop.trf.xlu1 }
 0x108   :  { %v107_v22 = vmul.f32 %v91_v21, %v91_v21  ;;  %v140_v23 = vmul.f32 -2.0, %v91_v21  ;;  %v302_v21 = vmul.f32 1e-06, %v294_v6 }
 0x10a   :  { %1442 = vmatmul.mubr.msk.f32.gmra.mxu0 %vm112_vm1, %v140_v23  ;;  %v122_v24 = vsel %vm112_vm1, %v107_v22, 0.0 }
 0x10b   :  { %123 = vadd.xlane.f32.xlu1 %v122_v24  ;;  %v92_v25 = vpop.trf.xlu1 }
 0x10c   :  { %v108_v26 = vmul.f32 %v92_v25, %v92_v25  ;;  %v141_v27 = vmul.f32 -2.0, %v92_v25 }
 0x10e   :  { %1444 = vmatprep.mubr.msk.f32.mxu0 %vm112_vm1, %v141_v27  ;;  %v125_v28 = vsel %vm112_vm1, %v108_v26, 0.0  ;;  %v301_v27 = vmul.f32 1e-06, %v293_v13 }
 0x10f   :  { %126 = vadd.xlane.f32.xlu0 %v125_v28  ;;  %v93_v29 = vpop.trf.xlu1 }
 0x110   :  { %v109_v30 = vmul.f32 %v93_v29, %v93_v29  ;;  %v142_v31 = vmul.f32 -2.0, %v93_v29 }
 0x112   :  { %1445 = vmatmul.mubr.msk.f32.gmra.mxu0 %vm112_vm1, %v142_v31  ;;  %v128_v32 = vsel %vm112_vm1, %v109_v30, 0.0 }
 0x113   :  { %129 = vadd.xlane.f32.xlu1 %v128_v32  ;;  %v94_v33 = vpop.trf.xlu1 }
 0x114   :  { %v110_v34 = vmul.f32 %v94_v33, %v94_v33  ;;  %v143_v35 = vmul.f32 -2.0, %v94_v33 }
 0x116   :  { %1447 = vmatprep.mubr.msk.f32.mxu0 %vm112_vm1, %v143_v35  ;;  %v131_v36 = vsel %vm112_vm1, %v110_v34, 0.0 }
 0x117   :  { %132 = vadd.xlane.f32.xlu0 %v131_v36  ;;  %v95_v37 = vpop.trf.xlu1 }
 0x118   :  { %v111_v38 = vmul.f32 %v95_v37, %v95_v37  ;;  %v144_v39 = vmul.f32 -2.0, %v95_v37 }
 0x11a   :  { %1448 = vmatmul.mubr.msk.f32.gmra.mxu0 %vm112_vm1, %v144_v39  ;;  %v134_v40 = vsel %vm112_vm1, %v111_v38, 0.0 }
 0x11b   :  { %135 = vadd.xlane.f32.xlu1 %v134_v40 }
 0x188   :  { %v115_v44 = vpop.xlane.xlu1 %114 }
 0x18c   :  { %v118_v51 = vpop.xlane.xlu0 %117 }
 0x190   :  { %v121_v47 = vpop.xlane.xlu1 %120 }
 0x194   :  { %v124_v58 = vpop.xlane.xlu1 %123 }
 0x198   :  { %v127_v63 = vpop.xlane.xlu0 %126 }
 0x19c   :  { %v130_v7 = vpop.xlane.xlu1 %129 }
 0x1a0   :  { %v133_v28 = vpop.xlane.xlu0 %132 }
 0x1a4   :  { %v136_v22 = vpop.xlane.xlu1 %135 }
 0x1c2   :  { %v1440_v42 = vpop.f32.mrf.mxu0 }
 0x1c3   :  { %v245_v14 = vadd.f32 %v1440_v42, %v118_v51 }
 0x1c4   :  { %v239_v45 = vpop.f32.mrf.mxu0 }
 0x1c5   :  { %v240_v10 = vadd.f32 %v239_v45, %v115_v44  ;;  %v1611_v29 = vadd.f32 %v296_v15, %v245_v14 }
 0x1c7   :  { %v1607_v24 = vadd.f32 %v295_v9, %v240_v10  ;;  %v313_v42 = vsel %vm311_vm2, %v1611_v29, inf }
 0x1c9   :  { %v312_v36 = vsel %vm311_vm2, %v1607_v24, inf }
 0x1ca   :  { %v1443_v48 = vpop.f32.mrf.mxu0 }
 0x1cb   :  { %v255_v16 = vadd.f32 %v1443_v48, %v124_v58 }
 0x1cc   :  { %v249_v54 = vpop.f32.mrf.mxu0 }
 0x1cd   :  { %v250_v18 = vadd.f32 %v249_v54, %v121_v47  ;;  %v1613_v30 = vadd.f32 %v298_v17, %v255_v16 }
 0x1cf   :  { %v1615_v32 = vadd.f32 %v297_v19, %v250_v18  ;;  %v315_v43 = vsel %vm311_vm2, %v1613_v30, inf }
 0x1d1   :  { %v314_v44 = vsel %vm311_vm2, %v1615_v32, inf }
 0x1d2   :  { %v1446_v60 = vpop.f32.mrf.mxu0 }
 0x1d3   :  { %v265_v11 = vadd.f32 %v1446_v60, %v130_v7 }
 0x1d4   :  { %v259_v2 = vpop.f32.mrf.mxu0 }
 0x1d5   :  { %v260_v4 = vadd.f32 %v259_v2, %v127_v63  ;;  %v1609_v25 = vadd.f32 %v300_v12, %v265_v11 }
 0x1d7   :  { %v1605_v20 = vadd.f32 %v299_v5, %v260_v4  ;;  %v318_v37 = vsel %vm311_vm2, %v1609_v25, inf }
 0x1d8   :  { %v319_v46 = vmin.f32 %v313_v42, %v318_v37 }
 0x1d9   :  { %v316_v33 = vsel %vm311_vm2, %v1605_v20, inf }
 0x1da   :  { %v1449_v23 = vpop.f32.mrf.mxu0  ;;  %v317_v40 = vmin.f32 %v312_v36, %v316_v33 }
 0x1db   :  { %v275_v26 = vadd.f32 %v1449_v23, %v136_v22 }
 0x1dc   :  { %v269_v31 = vpop.f32.mrf.mxu0  ;;  %v324_v49 = vmin.f32 %v317_v40, %v319_v46 }
 0x1dd   :  { %v1619_v34 = vadd.f32 %v302_v21, %v275_v26  ;;  %v270_v35 = vadd.f32 %v269_v31, %v133_v28 }
 0x1df   :  { %v322_v38 = vsel %vm311_vm2, %v1619_v34, inf  ;;  %v309_v39 = vadd.f32 %v301_v27, %v270_v35 }
 0x1e0   :  { %v323_v47 = vmin.f32 %v315_v43, %v322_v38 }
 0x1e1   :  { %v320_v45 = vsel %vm311_vm2, %v309_v39, inf }
 0x1e2   :  { %v321_v48 = vmin.f32 %v314_v44, %v320_v45 }
 0x1e4   :  { %v325_v50 = vmin.f32 %v321_v48, %v323_v47 }
 0x1e6   :  { %v326_v51 = vmin.f32 %v324_v49, %v325_v50 }
 0x1e8   :  { %v327_v52 = vrot.slane %v326_v51, 4 }
 0x1ea   :  { %v328_v53 = vmin.f32 %v326_v51, %v327_v52 }
 0x1ec   :  { %v329_v54 = vrot.slane %v328_v53, 2 }
 0x1ee   :  { %v330_v55 = vmin.f32 %v328_v53, %v329_v54 }
 0x1f0   :  { %v331_v56 = vrot.slane %v330_v55, 1 }
 0x1f2   :  { %v1634_v57 = vmin.f32 %v330_v55, %v331_v56 }
 0x1f4   :  { %vm333_vm3 = vcmp.eq.f32.partialorder %v1607_v24, %v1634_v57  ;;  %vm334_vm4 = vcmp.eq.f32.partialorder %v1611_v29, %v1634_v57  ;;  %vm335_vm5 = vcmp.eq.f32.partialorder %v1615_v32, %v1634_v57  ;;  %vm336_vm6 = vcmp.eq.f32.partialorder %v1613_v30, %v1634_v57 }
 0x1f5   :  { %vm337_vm7 = vcmp.eq.f32.partialorder %v1605_v20, %v1634_v57  ;;  %vm338_vm8 = vcmp.eq.f32.partialorder %v1609_v25, %v1634_v57  ;;  %vm339_vm9 = vcmp.eq.f32.partialorder %v309_v39, %v1634_v57  ;;  %vm340_vm10 = vcmp.eq.f32.partialorder %v1619_v34, %v1634_v57 }
 0x1f6   :  { %v1655_v58 = vsel %vm333_vm3, 1e+30, %v1607_v24  ;;  %v1661_v59 = vsel %vm334_vm4, 1e+30, %v1611_v29  ;;  %v367_v60 = vsel %vm335_vm5, 1e+30, %v1615_v32 }
 0x1f7   :  { %v368_v61 = vsel %vm336_vm6, 1e+30, %v1613_v30  ;;  %v1675_v62 = vsel %vm337_vm7, 1e+30, %v1605_v20  ;;  %v1681_v63 = vsel %vm338_vm8, 1e+30, %v1609_v25 }
 0x1f8   :  { %v371_v0 = vsel %vm339_vm9, 1e+30, %v309_v39  ;;  %v372_v1 = vsel %vm340_vm10, 1e+30, %v1619_v34  ;;  %v373_v2 = vsel %vm311_vm2, %v1655_v58, inf  ;;  %v374_v3 = vsel %vm311_vm2, %v1661_v59, inf }
 0x1f9   :  { %v375_v4 = vsel %vm311_vm2, %v367_v60, inf  ;;  %v376_v5 = vsel %vm311_vm2, %v368_v61, inf  ;;  %v377_v6 = vsel %vm311_vm2, %v1675_v62, inf  ;;  %v379_v7 = vsel %vm311_vm2, %v1681_v63, inf }
 0x1fa   :  { %v378_v9 = vmin.f32 %v373_v2, %v377_v6  ;;  %v380_v10 = vmin.f32 %v374_v3, %v379_v7  ;;  %v381_v11 = vsel %vm311_vm2, %v371_v0, inf  ;;  %v383_v12 = vsel %vm311_vm2, %v372_v1, inf }
 0x1fb   :  { %v382_v13 = vmin.f32 %v375_v4, %v381_v11  ;;  %v384_v14 = vmin.f32 %v376_v5, %v383_v12  ;;  %v1319_v26 = vsel %vm333_vm3, 1.0, %v1526_v41  ;;  %v1321_v27 = vsel %vm335_vm5, 1.0, %v1526_v41 }
 0x1fc   :  { %v385_v15 = vmin.f32 %v378_v9, %v380_v10  ;;  %v1322_v28 = vsel %vm336_vm6, 1.0, %v1526_v41  ;;  %v1323_v33 = vsel %vm337_vm7, 1.0, %v1526_v41  ;;  %v1324_v24 = vsel %vm338_vm8, 1.0, %v1526_v41 }
 0x1fd   :  { %v386_v16 = vmin.f32 %v382_v13, %v384_v14  ;;  %v1325_v32 = vsel %vm339_vm9, 1.0, %v1526_v41  ;;  %v1326_v30 = vsel %vm340_vm10, 1.0, %v1526_v41  ;;  %v1320_v9 = vsel %vm334_vm4, 1.0, %v1526_v41 }
 0x1ff   :  { %v387_v17 = vmin.f32 %v385_v15, %v386_v16 }
 0x201   :  { %v388_v18 = vrot.slane %v387_v17, 4 }
 0x203   :  { %v389_v19 = vmin.f32 %v387_v17, %v388_v18 }
 0x205   :  { %v390_v21 = vrot.slane %v389_v19, 2 }
 0x207   :  { %v391_v22 = vmin.f32 %v389_v19, %v390_v21 }
 0x209   :  { %v392_v23 = vrot.slane %v391_v22, 1 }
 0x20b   :  { %v393_v31 = vmin.f32 %v391_v22, %v392_v23 }
 0x20d   :  { %vm394_vm11 = vcmp.eq.f32.partialorder %v1655_v58, %v393_v31  ;;  %vm395_vm12 = vcmp.eq.f32.partialorder %v1661_v59, %v393_v31  ;;  %vm396_vm13 = vcmp.eq.f32.partialorder %v367_v60, %v393_v31  ;;  %vm397_vm14 = vcmp.eq.f32.partialorder %v368_v61, %v393_v31 }
 0x20e   :  { %vm398_vm15 = vcmp.eq.f32.partialorder %v1675_v62, %v393_v31  ;;  %vm399_vm0 = vcmp.eq.f32.partialorder %v1681_v63, %v393_v31  ;;  %vm400_vm1 = vcmp.eq.f32.partialorder %v371_v0, %v393_v31  ;;  %vm401_vm3 = vcmp.eq.f32.partialorder %v372_v1, %v393_v31 }
 0x20f   :  { %v1329_v20 = vsel %vm396_vm13, 1.0, %v1526_v41  ;;  %v1330_v25 = vsel %vm397_vm14, 1.0, %v1526_v41  ;;  %v1333_v34 = vsel %vm400_vm1, 1.0, %v1526_v41  ;;  %v1334_v35 = vsel %vm401_vm3, 1.0, %v1526_v41 }
 0x210   :  { %v420_v36 = vadd.f32 %v1329_v20, %v1321_v27  ;;  %v1740_v37 = vadd.f32 %v1330_v25, %v1322_v28  ;;  %v424_v38 = vadd.f32 %v1333_v34, %v1325_v32  ;;  %v1742_v39 = vadd.f32 %v1334_v35, %v1326_v30 }
 0x211   :  { %v1747_v40 = vsel %vm394_vm11, 1e+30, %v1655_v58  ;;  %v1752_v42 = vsel %vm395_vm12, 1e+30, %v1661_v59  ;;  %v428_v43 = vsel %vm396_vm13, 1e+30, %v367_v60 }
 0x212   :  { %v1756_v44 = vsel %vm397_vm14, 1e+30, %v368_v61  ;;  %v1761_v45 = vsel %vm398_vm15, 1e+30, %v1675_v62  ;;  %v1766_v46 = vsel %vm399_vm0, 1e+30, %v1681_v63 }
 0x213   :  { %v432_v47 = vsel %vm400_vm1, 1e+30, %v371_v0  ;;  %v1770_v48 = vsel %vm401_vm3, 1e+30, %v372_v1  ;;  %v434_v49 = vsel %vm311_vm2, %v1747_v40, inf  ;;  %v435_v50 = vsel %vm311_vm2, %v1752_v42, inf }
 0x214   :  { %v436_v51 = vsel %vm311_vm2, %v428_v43, inf  ;;  %v437_v52 = vsel %vm311_vm2, %v1756_v44, inf  ;;  %v438_v53 = vsel %vm311_vm2, %v1761_v45, inf  ;;  %v440_v54 = vsel %vm311_vm2, %v1766_v46, inf }
 0x215   :  { %v439_v55 = vmin.f32 %v434_v49, %v438_v53  ;;  %v441_v56 = vmin.f32 %v435_v50, %v440_v54  ;;  %v442_v60 = vsel %vm311_vm2, %v432_v47, inf  ;;  %v444_v61 = vsel %vm311_vm2, %v1770_v48, inf }
 0x216   :  { %v443_v0 = vmin.f32 %v436_v51, %v442_v60  ;;  %v445_v1 = vmin.f32 %v437_v52, %v444_v61  ;;  %v1331_v2 = vsel %vm398_vm15, 1.0, %v1526_v41  ;;  %v1332_v3 = vsel %vm399_vm0, 1.0, %v1526_v41 }
 0x217   :  { %v446_v4 = vmin.f32 %v439_v55, %v441_v56  ;;  %v422_v5 = vadd.f32 %v1331_v2, %v1323_v33  ;;  %v423_v6 = vadd.f32 %v1332_v3, %v1324_v24  ;;  %v1327_v7 = vsel %vm394_vm11, 1.0, %v1526_v41 }
 0x218   :  { %v447_v10 = vmin.f32 %v443_v0, %v445_v1  ;;  %v1328_v62 = vsel %vm395_vm12, 1.0, %v1526_v41  ;;  %v418_v11 = vadd.f32 %v1327_v7, %v1319_v26 }
 0x219   :  { %v419_v63 = vadd.f32 %v1328_v62, %v1320_v9 }
 0x21a   :  { %v448_v12 = vmin.f32 %v446_v4, %v447_v10 }
 0x21c   :  { %v449_v13 = vrot.slane %v448_v12, 4 }
 0x21e   :  { %v450_v14 = vmin.f32 %v448_v12, %v449_v13 }
 0x220   :  { %v451_v15 = vrot.slane %v450_v14, 2 }
 0x222   :  { %v452_v16 = vmin.f32 %v450_v14, %v451_v15 }
 0x224   :  { %v453_v17 = vrot.slane %v452_v16, 1 }
 0x226   :  { %v454_v58 = vmin.f32 %v452_v16, %v453_v17 }
 0x228   :  { %vm455_vm5 = vcmp.eq.f32.partialorder %v1747_v40, %v454_v58  ;;  %vm456_vm6 = vcmp.eq.f32.partialorder %v1752_v42, %v454_v58  ;;  %vm457_vm7 = vcmp.eq.f32.partialorder %v428_v43, %v454_v58  ;;  %vm458_vm4 = vcmp.eq.f32.partialorder %v1756_v44, %v454_v58 }
 0x229   :  { %vm459_vm8 = vcmp.eq.f32.partialorder %v1761_v45, %v454_v58  ;;  %vm460_vm9 = vcmp.eq.f32.partialorder %v1766_v46, %v454_v58  ;;  %vm461_vm10 = vcmp.eq.f32.partialorder %v432_v47, %v454_v58  ;;  %vm462_vm11 = vcmp.eq.f32.partialorder %v1770_v48, %v454_v58 }
 0x22a   :  { %v1337_v29 = vsel %vm457_vm7, 1.0, %v1526_v41  ;;  %v1341_v57 = vsel %vm461_vm10, 1.0, %v1526_v41  ;;  %v1813_v59 = vsel %vm455_vm5, 1e+30, %v1747_v40  ;;  %v1818_v18 = vsel %vm456_vm6, 1e+30, %v1752_v42 }
 0x22b   :  { %v1820_v19 = vadd.f32 %v1337_v29, %v420_v36  ;;  %v485_v21 = vadd.f32 %v1341_v57, %v424_v38  ;;  %v1822_v22 = vsel %vm457_vm7, 1e+30, %v428_v43  ;;  %v1827_v23 = vsel %vm458_vm4, 1e+30, %v1756_v44 }
 0x22c   :  { %v1832_v26 = vsel %vm459_vm8, 1e+30, %v1761_v45  ;;  %v1837_v27 = vsel %vm460_vm9, 1e+30, %v1766_v46  ;;  %v493_v28 = vsel %vm461_vm10, 1e+30, %v432_v47 }
 0x22d   :  { %v494_v31 = vsel %vm462_vm11, 1e+30, %v1770_v48  ;;  %v495_v33 = vsel %vm311_vm2, %v1813_v59, inf  ;;  %v496_v24 = vsel %vm311_vm2, %v1818_v18, inf  ;;  %v497_v32 = vsel %vm311_vm2, %v1822_v22, inf }
 0x22e   :  { %v498_v30 = vsel %vm311_vm2, %v1827_v23, inf  ;;  %v499_v20 = vsel %vm311_vm2, %v1832_v26, inf  ;;  %v501_v25 = vsel %vm311_vm2, %v1837_v27, inf  ;;  %v503_v34 = vsel %vm311_vm2, %v493_v28, inf }
 0x22f   :  { %v500_v35 = vmin.f32 %v495_v33, %v499_v20  ;;  %v502_v36 = vmin.f32 %v496_v24, %v501_v25  ;;  %v504_v38 = vmin.f32 %v497_v32, %v503_v34  ;;  %v505_v43 = vsel %vm311_vm2, %v494_v31, inf }
 0x230   :  { %v506_v47 = vmin.f32 %v498_v30, %v505_v43  ;;  %v1342_v49 = vsel %vm462_vm11, 1.0, %v1526_v41  ;;  %v1339_v50 = vsel %vm459_vm8, 1.0, %v1526_v41  ;;  %v1340_v51 = vsel %vm460_vm9, 1.0, %v1526_v41 }
 0x231   :  { %v507_v52 = vmin.f32 %v500_v35, %v502_v36  ;;  %v486_v53 = vadd.f32 %v1342_v49, %v1742_v39  ;;  %v483_v54 = vadd.f32 %v1339_v50, %v422_v5  ;;  %v484_v55 = vadd.f32 %v1340_v51, %v423_v6 }
 0x232   :  { %v508_v56 = vmin.f32 %v504_v38, %v506_v47  ;;  %v1338_v60 = vsel %vm458_vm4, 1.0, %v1526_v41  ;;  %v1335_v48 = vsel %vm455_vm5, 1.0, %v1526_v41  ;;  %v1336_v45 = vsel %vm456_vm6, 1.0, %v1526_v41 }
 0x233   :  { %v482_v46 = vadd.f32 %v1338_v60, %v1740_v37  ;;  %v479_v61 = vadd.f32 %v1335_v48, %v418_v11  ;;  %v480_v0 = vadd.f32 %v1336_v45, %v419_v63 }
 0x234   :  { %v509_v39 = vmin.f32 %v507_v52, %v508_v56 }
 0x236   :  { %v510_v1 = vrot.slane %v509_v39, 4 }
 0x238   :  { %v511_v2 = vmin.f32 %v509_v39, %v510_v1 }
 0x23a   :  { %v512_v3 = vrot.slane %v511_v2, 2 }
 0x23c   :  { %v513_v4 = vmin.f32 %v511_v2, %v512_v3 }
 0x23e   :  { %v514_v5 = vrot.slane %v513_v4, 1 }
 0x240   :  { %v515_v44 = vmin.f32 %v513_v4, %v514_v5 }
 0x242   :  { %vm516_vm12 = vcmp.eq.f32.partialorder %v1813_v59, %v515_v44  ;;  %vm517_vm13 = vcmp.eq.f32.partialorder %v1818_v18, %v515_v44  ;;  %vm518_vm14 = vcmp.eq.f32.partialorder %v1822_v22, %v515_v44  ;;  %vm519_vm15 = vcmp.eq.f32.partialorder %v1827_v23, %v515_v44 }
 0x243   :  { %vm520_vm0 = vcmp.eq.f32.partialorder %v1832_v26, %v515_v44  ;;  %vm521_vm1 = vcmp.eq.f32.partialorder %v1837_v27, %v515_v44  ;;  %vm522_vm3 = vcmp.eq.f32.partialorder %v493_v28, %v515_v44  ;;  %vm523_vm5 = vcmp.eq.f32.partialorder %v494_v31, %v515_v44 }
 0x244   :  { %v1349_v37 = vsel %vm522_vm3, 1.0, %v1526_v41  ;;  %v1886_v40 = vsel %vm516_vm12, 1e+30, %v1813_v59  ;;  %v1891_v42 = vsel %vm517_vm13, 1e+30, %v1818_v18  ;;  %v1350_v6 = vsel %vm523_vm5, 1.0, %v1526_v41 }
 0x245   :  { %v546_v7 = vadd.f32 %v1349_v37, %v485_v21  ;;  %v1897_v9 = vsel %vm518_vm14, 1e+30, %v1822_v22  ;;  %v1902_v10 = vsel %vm519_vm15, 1e+30, %v1827_v23  ;;  %v1907_v62 = vsel %vm520_vm0, 1e+30, %v1832_v26 }
 0x246   :  { %v1912_v11 = vsel %vm521_vm1, 1e+30, %v1837_v27  ;;  %v554_v63 = vsel %vm522_vm3, 1e+30, %v493_v28  ;;  %v555_v12 = vsel %vm523_vm5, 1e+30, %v494_v31  ;;  %v547_v13 = vadd.f32 %v1350_v6, %v486_v53 }
 0x247   :  { %v556_v14 = vsel %vm311_vm2, %v1886_v40, inf  ;;  %v557_v15 = vsel %vm311_vm2, %v1891_v42, inf  ;;  %v558_v16 = vsel %vm311_vm2, %v1897_v9, inf  ;;  %v559_v17 = vsel %vm311_vm2, %v1902_v10, inf }
 0x248   :  { %v560_v58 = vsel %vm311_vm2, %v1907_v62, inf  ;;  %v562_v29 = vsel %vm311_vm2, %v1912_v11, inf  ;;  %v564_v57 = vsel %vm311_vm2, %v554_v63, inf  ;;  %v566_v21 = vsel %vm311_vm2, %v555_v12, inf }
 0x249   :  { %v561_v28 = vmin.f32 %v556_v14, %v560_v58  ;;  %v563_v31 = vmin.f32 %v557_v15, %v562_v29  ;;  %v565_v33 = vmin.f32 %v558_v16, %v564_v57  ;;  %v567_v24 = vmin.f32 %v559_v17, %v566_v21 }
 0x24a   :  { %v1347_v32 = vsel %vm520_vm0, 1.0, %v1526_v41  ;;  %v1348_v30 = vsel %vm521_vm1, 1.0, %v1526_v41  ;;  %v1345_v20 = vsel %vm518_vm14, 1.0, %v1526_v41  ;;  %v1346_v25 = vsel %vm519_vm15, 1.0, %v1526_v41 }
 0x24b   :  { %v568_v34 = vmin.f32 %v561_v28, %v563_v31  ;;  %v569_v35 = vmin.f32 %v565_v33, %v567_v24  ;;  %v544_v36 = vadd.f32 %v1347_v32, %v483_v54  ;;  %v545_v38 = vadd.f32 %v1348_v30, %v484_v55 }
 0x24c   :  { %v542_v43 = vadd.f32 %v1345_v20, %v1820_v19  ;;  %v543_v26 = vadd.f32 %v1346_v25, %v482_v46  ;;  %v1343_v27 = vsel %vm516_vm12, 1.0, %v1526_v41  ;;  %v1344_v22 = vsel %vm517_vm13, 1.0, %v1526_v41 }
 0x24d   :  { %v570_v47 = vmin.f32 %v568_v34, %v569_v35  ;;  %v540_v49 = vadd.f32 %v1343_v27, %v479_v61  ;;  %v541_v50 = vadd.f32 %v1344_v22, %v480_v0 }
 0x24f   :  { %v571_v23 = vrot.slane %v570_v47, 4 }
 0x251   :  { %v572_v51 = vmin.f32 %v570_v47, %v571_v23 }
 0x253   :  { %v573_v52 = vrot.slane %v572_v51, 2 }
 0x255   :  { %v574_v53 = vmin.f32 %v572_v51, %v573_v52 }
 0x257   :  { %v575_v54 = vrot.slane %v574_v53, 1 }
 0x259   :  { %v576_v55 = vmin.f32 %v574_v53, %v575_v54 }
 0x25b   :  { %vm577_vm6 = vcmp.eq.f32.partialorder %v1886_v40, %v576_v55  ;;  %vm578_vm7 = vcmp.eq.f32.partialorder %v1891_v42, %v576_v55  ;;  %vm579_vm4 = vcmp.eq.f32.partialorder %v1897_v9, %v576_v55  ;;  %vm581_vm8 = vcmp.eq.f32.partialorder %v1907_v62, %v576_v55 }
 0x25c   :  { %vm582_vm9 = vcmp.eq.f32.partialorder %v1912_v11, %v576_v55  ;;  %vm583_vm10 = vcmp.eq.f32.partialorder %v554_v63, %v576_v55  ;;  %v1955_v59 = vsel %vm577_vm6, 1e+30, %v1886_v40  ;;  %v1960_v18 = vsel %vm578_vm7, 1e+30, %v1891_v42 }
 0x25d   :  { %v1357_v19 = vsel %vm583_vm10, 1.0, %v1526_v41  ;;  %v1966_v56 = vsel %vm579_vm4, 1e+30, %v1897_v9  ;;  %v1971_v60 = vsel %vm581_vm8, 1e+30, %v1907_v62  ;;  %vm580_vm11 = vcmp.eq.f32.partialorder %v1902_v10, %v576_v55 }
 0x25e   :  { %v1974_v48 = vadd.f32 %v1357_v19, %v546_v7  ;;  %v1979_v45 = vsel %vm582_vm9, 1e+30, %v1912_v11  ;;  %v1981_v46 = vsel %vm583_vm10, 1e+30, %v554_v63  ;;  %v619_v61 = vsel %vm311_vm2, %v1966_v56, inf }
 0x25f   :  { %v625_v0 = vsel %vm311_vm2, %v1981_v46, inf  ;;  %vm584_vm12 = vcmp.eq.f32.partialorder %v555_v12, %v576_v55  ;;  %v1990_v39 = vsel %vm580_vm11, 1e+30, %v1902_v10  ;;  %v617_v1 = vsel %vm311_vm2, %v1955_v59, inf }
 0x260   :  { %v626_v2 = vmin.f32 %v619_v61, %v625_v0  ;;  %v1358_v3 = vsel %vm584_vm12, 1.0, %v1526_v41  ;;  %v1995_v4 = vsel %vm584_vm12, 1e+30, %v555_v12  ;;  %v618_v5 = vsel %vm311_vm2, %v1960_v18, inf }
 0x261   :  { %v1999_v44 = vadd.f32 %v1358_v3, %v547_v13  ;;  %v620_v37 = vsel %vm311_vm2, %v1990_v39, inf  ;;  %v621_v6 = vsel %vm311_vm2, %v1971_v60, inf  ;;  %v623_v7 = vsel %vm311_vm2, %v1979_v45, inf }
 0x262   :  { %v622_v63 = vmin.f32 %v617_v1, %v621_v6  ;;  %v624_v14 = vmin.f32 %v618_v5, %v623_v7  ;;  %v627_v12 = vsel %vm311_vm2, %v1995_v4, inf  ;;  %v1355_v15 = vsel %vm581_vm8, 1.0, %v1526_v41 }
 0x263   :  { %v628_v13 = vmin.f32 %v620_v37, %v627_v12  ;;  %v1356_v16 = vsel %vm582_vm9, 1.0, %v1526_v41  ;;  %v2015_v17 = vadd.f32 %v1355_v15, %v544_v36  ;;  %v1353_v58 = vsel %vm579_vm4, 1.0, %v1526_v41 }
 0x264   :  { %v629_v29 = vmin.f32 %v622_v63, %v624_v14  ;;  %v2020_v57 = vadd.f32 %v1356_v16, %v545_v38  ;;  %v1354_v21 = vsel %vm580_vm11, 1.0, %v1526_v41  ;;  %v603_v62 = vadd.f32 %v1353_v58, %v542_v43 }
 0x265   :  { %v630_v28 = vmin.f32 %v626_v2, %v628_v13  ;;  %v604_v31 = vadd.f32 %v1354_v21, %v543_v26  ;;  %v1351_v11 = vsel %vm577_vm6, 1.0, %v1526_v41  ;;  %v1352_v33 = vsel %vm578_vm7, 1.0, %v1526_v41 }
 0x266   :  { %v2031_v9 = vadd.f32 %v1351_v11, %v540_v49  ;;  %v2033_v24 = vadd.f32 %v1352_v33, %v541_v50  ;;  %vm2556_vm7 = vmmov 0  }
 0x267   :  { %v631_v32 = vmin.f32 %v629_v29, %v630_v28  ;;  %1452 = vmatprep.mubr.msk.bf16.mxu1 %vm2556_vm7, %v1526_v41  ;;  %1464 = vmatprep.mubr.msk.bf16.mxu0 %vm2556_vm7, %v1526_v41 }
 0x269   :  { %v632_v30 = vrot.slane %v631_v32, 4 }
 0x26b   :  { %v633_v20 = vmin.f32 %v631_v32, %v632_v30 }
 0x26d   :  { %v634_v10 = vrot.slane %v633_v20, 2 }
 0x26f   :  { %v635_v25 = vmin.f32 %v633_v20, %v634_v10 }
 0x271   :  { %v636_v34 = vrot.slane %v635_v25, 1 }
 0x273   :  { %v2035_v35 = vmin.f32 %v635_v25, %v636_v34 }
 0x275   :  { %vm638_vm13 = vcmp.eq.f32.partialorder %v1955_v59, %v2035_v35  ;;  %vm639_vm14 = vcmp.eq.f32.partialorder %v1960_v18, %v2035_v35  ;;  %vm640_vm15 = vcmp.eq.f32.partialorder %v1966_v56, %v2035_v35  ;;  %vm641_vm0 = vcmp.eq.f32.partialorder %v1990_v39, %v2035_v35 }
 0x276   :  { %vm642_vm1 = vcmp.eq.f32.partialorder %v1971_v60, %v2035_v35  ;;  %vm643_vm3 = vcmp.eq.f32.partialorder %v1979_v45, %v2035_v35  ;;  %vm644_vm5 = vcmp.eq.f32.partialorder %v1981_v46, %v2035_v35  ;;  %vm645_vm6 = vcmp.eq.f32.partialorder %v1995_v4, %v2035_v35 }
 0x277   :  { %v2057_v40 = vsel %vm638_vm13, 1e+30, %v1955_v59  ;;  %v2063_v42 = vsel %vm639_vm14, 1e+30, %v1960_v18  ;;  %v2069_v36 = vsel %vm640_vm15, 1e+30, %v1966_v56 }
 0x278   :  { %v2075_v38 = vsel %vm641_vm0, 1e+30, %v1990_v39  ;;  %v2081_v43 = vsel %vm642_vm1, 1e+30, %v1971_v60  ;;  %v2087_v26 = vsel %vm643_vm3, 1e+30, %v1979_v45 }
 0x279   :  { %v2093_v27 = vsel %vm644_vm5, 1e+30, %v1981_v46  ;;  %v2099_v22 = vsel %vm645_vm6, 1e+30, %v1995_v4  ;;  %v678_v47 = vsel %vm311_vm2, %v2057_v40, inf  ;;  %v679_v49 = vsel %vm311_vm2, %v2063_v42, inf }
 0x27a   :  { %v680_v50 = vsel %vm311_vm2, %v2069_v36, inf  ;;  %v681_v23 = vsel %vm311_vm2, %v2075_v38, inf  ;;  %v682_v51 = vsel %vm311_vm2, %v2081_v43, inf  ;;  %v684_v52 = vsel %vm311_vm2, %v2087_v26, inf }
 0x27b   :  { %v686_v53 = vsel %vm311_vm2, %v2093_v27, inf  ;;  %v683_v54 = vmin.f32 %v678_v47, %v682_v51  ;;  %v685_v55 = vmin.f32 %v679_v49, %v684_v52  ;;  %v688_v61 = vsel %vm311_vm2, %v2099_v22, inf }
 0x27c   :  { %v687_v19 = vmin.f32 %v680_v50, %v686_v53  ;;  %v689_v0 = vmin.f32 %v681_v23, %v688_v61  ;;  %v1361_v1 = vsel %vm640_vm15, 1.0, %v1526_v41  ;;  %v1362_v3 = vsel %vm641_vm0, 1.0, %v1526_v41 }
 0x27d   :  { %v690_v2 = vmin.f32 %v683_v54, %v685_v55  ;;  %v2125_v37 = vadd.f32 %v1361_v1, %v603_v62  ;;  %v2127_v6 = vadd.f32 %v1362_v3, %v604_v31  ;;  %v1359_v46 = vsel %vm638_vm13, 1.0, %v1526_v41 }
 0x27e   :  { %v691_v5 = vmin.f32 %v687_v19, %v689_v0  ;;  %v1360_v4 = vsel %vm639_vm14, 1.0, %v1526_v41 }
 0x280   :  { %v692_v7 = vmin.f32 %v690_v2, %v691_v5 }
 0x282   :  { %v693_v56 = vrot.slane %v692_v7, 4 }
 0x284   :  { %v694_v63 = vmin.f32 %v692_v7, %v693_v56 }
 0x286   :  { %v695_v14 = vrot.slane %v694_v63, 2 }
 0x288   :  { %v696_v12 = vmin.f32 %v694_v63, %v695_v14 }
 0x28a   :  { %v697_v15 = vrot.slane %v696_v12, 1 }
 0x28c   :  { %v2133_v39 = vmin.f32 %v696_v12, %v697_v15 }
 0x28e   :  { %vm2559_vm4 = vcmp.eq.f32.partialorder %v2057_v40, %v2133_v39  ;;  %vm2558_vm8 = vcmp.eq.f32.partialorder %v2063_v42, %v2133_v39  ;;  %vm2561_vm9 = vcmp.eq.f32.partialorder %v2069_v36, %v2133_v39  ;;  %vm2560_vm10 = vcmp.eq.f32.partialorder %v2075_v38, %v2133_v39 }
 0x28f   :  { %vm2563_vm11 = vcmp.eq.f32.partialorder %v2081_v43, %v2133_v39  ;;  %vm2562_vm12 = vcmp.eq.f32.partialorder %v2087_v26, %v2133_v39  ;;  %vm705_vm15 = vcmp.eq.f32.partialorder %v2093_v27, %v2133_v39  ;;  %vm2564_vm0 = vcmp.eq.f32.partialorder %v2099_v22, %v2133_v39 }
 0x290   :  { %v2155_v13 = vsel %vm2559_vm4, 1e+30, %v2057_v40  ;;  %v2161_v16 = vsel %vm2558_vm8, 1e+30, %v2063_v42  ;;  %v2167_v58 = vsel %vm2561_vm9, 1e+30, %v2069_v36  ;;  %vm2565_vm13 = vcmp.eq.f32.partialorder %v2099_v22, %v2133_v39 }
 0x291   :  { %v2173_v29 = vsel %vm2560_vm10, 1e+30, %v2075_v38  ;;  %v2179_v21 = vsel %vm2563_vm11, 1e+30, %v2081_v43  ;;  %v2185_v62 = vsel %vm2562_vm12, 1e+30, %v2087_v26  ;;  %vm2566_vm14 = vcmp.eq.f32.partialorder %v2081_v43, %v2133_v39 }
 0x292   :  { %v2191_v28 = vsel %vm705_vm15, 1e+30, %v2093_v27  ;;  %v2197_v31 = vsel %vm2564_vm0, 1e+30, %v2099_v22  ;;  %v739_v11 = vsel %vm311_vm2, %v2155_v13, inf  ;;  %v740_v33 = vsel %vm311_vm2, %v2161_v16, inf }
 0x293   :  { %v741_v32 = vsel %vm311_vm2, %v2167_v58, inf  ;;  %v742_v30 = vsel %vm311_vm2, %v2173_v29, inf  ;;  %v743_v20 = vsel %vm311_vm2, %v2179_v21, inf  ;;  %v745_v10 = vsel %vm311_vm2, %v2185_v62, inf }
 0x294   :  { %v747_v25 = vsel %vm311_vm2, %v2191_v28, inf  ;;  %v744_v34 = vmin.f32 %v739_v11, %v743_v20  ;;  %v746_v47 = vmin.f32 %v740_v33, %v745_v10  ;;  %v749_v50 = vsel %vm311_vm2, %v2197_v31, inf }
 0x295   :  { %v748_v49 = vmin.f32 %v741_v32, %v747_v25  ;;  %v750_v23 = vmin.f32 %v742_v30, %v749_v50  ;;  %v1373_v60 = vsel %vm705_vm15, 1.0, %v1526_v41  ;;  %v1374_v18 = vsel %vm2565_vm13, 1.0, %v1526_v41 }
 0x296   :  { %v751_v51 = vmin.f32 %v744_v34, %v746_v47  ;;  %v1371_v35 = vsel %vm2566_vm14, 1.0, %v1526_v41  ;;  %v663_v27 = vadd.f32 %v1360_v4, %v2033_v24  ;;  %vm2571_vm15 = vcmp.eq.f32.partialorder %v2063_v42, %v2133_v39 }
 0x297   :  { %v752_v52 = vmin.f32 %v748_v49, %v750_v23  ;;  %vm886_vm13 = vcmask 1043456   ;;  %vm882_vm14 = vcmask 64512  }
 0x299   :  { %v753_v53 = vmin.f32 %v751_v51, %v752_v52 }
 0x29b   :  { %v754_v54 = vrot.slane %v753_v53, 4 }
 0x29d   :  { %v755_v55 = vmin.f32 %v753_v53, %v754_v54  ;;  %v1365_v53 = vsel %vm644_vm5, 1.0, %v1526_v41  ;;  %v1366_v54 = vsel %vm645_vm6, 1.0, %v1526_v41  ;;  %vm2569_vm5 = vcmp.eq.f32.partialorder %v2075_v38, %v2133_v39 }
 0x29e   :  { %v669_v45 = vadd.f32 %v1366_v54, %v1999_v44  ;;  %vm2570_vm6 = vcmp.eq.f32.partialorder %v2057_v40, %v2133_v39 }
 0x29f   :  { %v756_v19 = vrot.slane %v755_v55, 2 }
 0x2a0   :  { %v730_v22 = vadd.f32 %v1374_v18, %v669_v45 }
 0x2a1   :  { %v757_v61 = vmin.f32 %v755_v55, %v756_v19  ;;  %v1363_v19 = vsel %vm642_vm1, 1.0, %v1526_v41  ;;  %vm2567_vm1 = vcmp.eq.f32.partialorder %v2087_v26, %v2133_v39  ;;  %v1367_v26 = vsel %vm2570_vm6, 1.0, %v1526_v41 }
 0x2a3   :  { %v758_v0 = vrot.slane %v757_v61, 1 }
 0x2a5   :  { %v2215_v1 = vmin.f32 %v757_v61, %v758_v0  ;;  %v1364_v61 = vsel %vm643_vm3, 1.0, %v1526_v41  ;;  %v668_v0 = vadd.f32 %v1365_v53, %v1974_v48  ;;  %vm2568_vm3 = vcmp.eq.f32.partialorder %v2069_v36, %v2133_v39 }
 0x2a6   :  { %v667_v59 = vadd.f32 %v1364_v61, %v2020_v57  ;;  %v1369_v57 = vsel %vm2568_vm3, 1.0, %v1526_v41  ;;  %v1368_v36 = vsel %vm2571_vm15, 1.0, %v1526_v41  ;;  %vm983_vm3 = vcmask 130048  }
 0x2a7   :  { %vm760_vm7 = vcmp.eq.f32.partialorder %v2155_v13, %v2215_v1  ;;  %vm761_vm8 = vcmp.eq.f32.partialorder %v2161_v16, %v2215_v1  ;;  %vm762_vm4 = vcmp.eq.f32.partialorder %v2167_v58, %v2215_v1  ;;  %vm763_vm10 = vcmp.eq.f32.partialorder %v2173_v29, %v2215_v1 }
 0x2a8   :  { %vm764_vm9 = vcmp.eq.f32.partialorder %v2179_v21, %v2215_v1  ;;  %vm765_vm12 = vcmp.eq.f32.partialorder %v2185_v62, %v2215_v1  ;;  %vm766_vm11 = vcmp.eq.f32.partialorder %v2191_v28, %v2215_v1  ;;  %vm767_vm0 = vcmp.eq.f32.partialorder %v2197_v31, %v2215_v1 }
 0x2a9   :  { %v2237_v2 = vsel %vm760_vm7, 1e+30, %v2155_v13  ;;  %v2243_v3 = vsel %vm761_vm8, 1e+30, %v2161_v16  ;;  %v2249_v5 = vsel %vm762_vm4, 1e+30, %v2167_v58  ;;  %v729_v44 = vadd.f32 %v1373_v60, %v668_v0 }
 0x2aa   :  { %v2255_v7 = vsel %vm763_vm10, 1e+30, %v2173_v29  ;;  %v2261_v56 = vsel %vm764_vm9, 1e+30, %v2179_v21  ;;  %v2267_v63 = vsel %vm765_vm12, 1e+30, %v2185_v62  ;;  %v725_v39 = vadd.f32 %v1369_v57, %v2125_v37 }
 0x2ab   :  { %v2273_v14 = vsel %vm766_vm11, 1e+30, %v2191_v28  ;;  %v2279_v12 = vsel %vm767_vm0, 1e+30, %v2197_v31  ;;  %v800_v15 = vsel %vm311_vm2, %v2237_v2, inf  ;;  %v801_v11 = vsel %vm311_vm2, %v2243_v3, inf }
 0x2ac   :  { %v802_v33 = vsel %vm311_vm2, %v2249_v5, inf  ;;  %v803_v32 = vsel %vm311_vm2, %v2255_v7, inf  ;;  %v804_v30 = vsel %vm311_vm2, %v2261_v56, inf  ;;  %v806_v20 = vsel %vm311_vm2, %v2267_v63, inf }
 0x2ad   :  { %v808_v10 = vsel %vm311_vm2, %v2273_v14, inf  ;;  %v805_v25 = vmin.f32 %v800_v15, %v804_v30  ;;  %v807_v34 = vmin.f32 %v801_v11, %v806_v20  ;;  %v810_v49 = vsel %vm311_vm2, %v2279_v12, inf }
 0x2ae   :  { %v809_v47 = vmin.f32 %v802_v33, %v808_v10  ;;  %v811_v50 = vmin.f32 %v803_v32, %v810_v49  ;;  %v666_v11 = vadd.f32 %v1363_v19, %v2015_v17  ;;  %v662_v33 = vadd.f32 %v1359_v46, %v2031_v9 }
 0x2af   :  { %v812_v23 = vmin.f32 %v805_v25, %v807_v34  ;;  %v1372_v17 = vsel %vm2567_vm1, 1.0, %v1526_v41  ;;  %v1370_v9 = vsel %vm2569_vm5, 1.0, %v1526_v41  ;;  %v1381_v24 = vsel %vm766_vm11, 1.0, %v1526_v41 }
 0x2b0   :  { %v813_v51 = vmin.f32 %v809_v47, %v811_v50  ;;  %v1382_v38 = vsel %vm767_vm0, 1.0, %v1526_v41  ;;  %v727_v32 = vadd.f32 %v1371_v35, %v666_v11  ;;  %v1379_v28 = vsel %vm764_vm9, 1.0, %v1526_v41 }
 0x2b1   :  { %v728_v40 = vadd.f32 %v1372_v17, %v667_v59  ;;  %v1380_v42 = vsel %vm765_vm12, 1.0, %v1526_v41  ;;  %v790_v20 = vadd.f32 %v1381_v24, %v729_v44  ;;  %v726_v10 = vadd.f32 %v1370_v9, %v2127_v6 }
 0x2b2   :  { %v814_v52 = vmin.f32 %v812_v23, %v813_v51  ;;  %v723_v31 = vadd.f32 %v1367_v26, %v662_v33  ;;  %v724_v25 = vadd.f32 %v1368_v36, %v663_v27  ;;  %v791_v34 = vadd.f32 %v1382_v38, %v730_v22 }
 0x2b3   :  { %v788_v49 = vadd.f32 %v1379_v28, %v727_v32  ;;  %v1377_v21 = vsel %vm762_vm4, 1.0, %v1526_v41  ;;  %v789_v50 = vadd.f32 %v1380_v42, %v728_v40  ;;  %v1378_v62 = vsel %vm763_vm10, 1.0, %v1526_v41  ;;  %v61_v42 = vld [vmem:[%s2551_s1] sm:$0xff] }
 0x2b4   :  { %v815_v55 = vrot.slane %v814_v52, 4  ;;  %v1375_v37 = vsel %vm760_vm7, 1.0, %v1526_v41  ;;  %v1376_v6 = vsel %vm761_vm8, 1.0, %v1526_v41  ;;  %vm2572_vm1 = vmmov 0  }
 0x2b5   :  { %v785_v19 = vadd.f32 %v1376_v6, %v724_v25 }
 0x2b6   :  { %v816_v15 = vmin.f32 %v814_v52, %v815_v55 }
 0x2b8   :  { %v817_v48 = vrot.slane %v816_v15, 2 }
 0x2ba   :  { %v818_v43 = vmin.f32 %v816_v15, %v817_v48 }
 0x2bc   :  { %v819_v30 = vrot.slane %v818_v43, 1 }
 0x2be   :  { %v820_v47 = vmin.f32 %v818_v43, %v819_v30 }
 0x2c0   :  { %vm827_vm9 = vcmp.eq.f32.partialorder %v2273_v14, %v820_v47  ;;  %vm828_vm4 = vcmp.eq.f32.partialorder %v2279_v12, %v820_v47  ;;  %vm825_vm11 = vcmp.eq.f32.partialorder %v2261_v56, %v820_v47  ;;  %vm826_vm12 = vcmp.eq.f32.partialorder %v2267_v63, %v820_v47 }
 0x2c1   :  { %v1389_v58 = vsel %vm827_vm9, 1.0, %v1526_v41  ;;  %v1390_v29 = vsel %vm828_vm4, 1.0, %v1526_v41  ;;  %v1387_v13 = vsel %vm825_vm11, 1.0, %v1526_v41  ;;  %v1388_v23 = vsel %vm826_vm12, 1.0, %v1526_v41 }
 0x2c2   :  { %v851_v51 = vadd.f32 %v1389_v58, %v790_v20  ;;  %v852_v52 = vadd.f32 %v1390_v29, %v791_v34  ;;  %v849_v16 = vadd.f32 %v1387_v13, %v788_v49  ;;  %v850_v1 = vadd.f32 %v1388_v23, %v789_v50 }
 0x2c3   :  { %vm823_vm7 = vcmp.eq.f32.partialorder %v2249_v5, %v820_v47  ;;  %vm824_vm8 = vcmp.eq.f32.partialorder %v2255_v7, %v820_v47  ;;  %vm821_vm10 = vcmp.eq.f32.partialorder %v2237_v2, %v820_v47  ;;  %vm822_vm0 = vcmp.eq.f32.partialorder %v2243_v3, %v820_v47 }
 0x2c4   :  { %v2405_v56 = vpack.c.bf16 %v852_v52, %v851_v51  ;;  %v786_v63 = vadd.f32 %v1377_v21, %v725_v39  ;;  %v787_v14 = vadd.f32 %v1378_v62, %v726_v10  ;;  %v784_v12 = vadd.f32 %v1375_v37, %v723_v31  ;;  %v62_v39 = vld [vmem:[%s2551_s1 + $0x8] sm:$0xff] }
 0x2c5   :  { %v2407_v53 = vpack.c.bf16 %v850_v1, %v849_v16  ;;  %v1385_v54 = vsel %vm823_vm7, 1.0, %v1526_v41  ;;  %v1386_v55 = vsel %vm824_vm8, 1.0, %v1526_v41  ;;  %v1383_v2 = vsel %vm821_vm10, 1.0, %v1526_v41 }
 0x2c6   :  { %1457 = vmatpush3.bf16.msra.mxu0 %v2405_v56  ;;  %v847_v5 = vadd.f32 %v1385_v54, %v786_v63  ;;  %v848_v7 = vadd.f32 %v1386_v55, %v787_v14  ;;  %v1384_v3 = vsel %vm822_vm0, 1.0, %v1526_v41  ;;  %v845_v61 = vadd.f32 %v1383_v2, %v784_v12 }
 0x2c7   :  { %1458 = vmatprep.subr.bf16.mxu0 %v1526_v41  ;;  %v846_v46 = vadd.f32 %v1384_v3, %v785_v19  ;;  %v860_v48 = vsel %vm311_vm2, %v849_v16, 0.0  ;;  %v862_v27 = vsel %vm311_vm2, %v850_v1, 0.0  ;;  %v864_v17 = vsel %vm311_vm2, %v851_v51, 0.0  ;;  %v64_v16 = vld [vmem:[%s2552_s2] sm:$0xff]  ;;  %v65_v1 = vld [vmem:[%s2552_s2 + $0x8] sm:$0xff] }
 0x2c8   :  { %v2415_v4 = vpack.c.bf16 %v848_v7, %v847_v5  ;;  %v853_v0 = vsel %vm311_vm2, %v845_v61, 0.0  ;;  %v856_v11 = vsel %vm311_vm2, %v847_v5, 0.0  ;;  %v858_v33 = vsel %vm311_vm2, %v848_v7, 0.0 }
 0x2c9   :  { %v854_v60 = vsel %vm311_vm2, %v846_v46, 0.0  ;;  %v2419_v15 = vpack.c.bf16 %v846_v46, %v845_v61  ;;  %v866_v9 = vsel %vm311_vm2, %v852_v52, 0.0  ;;  %v63_v31 = vpack.c.bf16 %v62_v39, %v61_v42  ;;  %v70_v39 = vld [vmem:[%s2554_s4] sm:$0xff] }
 0x2ca   :  { %1459 = vmatpush3.bf16.msra.mxu0 %v2407_v53  ;;  %v855_v45 = vadd.f32 %v854_v60, %v853_v0  ;;  %v66_v14 = vpack.c.bf16 %v65_v1, %v64_v16 }
 0x2cb   :  { %1460 = vmatprep.subr.bf16.mxu0 %v1526_v41 }
 0x2cc   :  { %v857_v59 = vadd.f32 %v856_v11, %v855_v45 }
 0x2ce   :  { %1461 = vmatpush3.bf16.msra.mxu0 %v2415_v4  ;;  %v859_v18 = vadd.f32 %v858_v33, %v857_v59  ;;  %v67_v33 = vld [vmem:[%s2553_s3] sm:$0xff] }
 0x2cf   :  { %1462 = vmatprep.subr.bf16.mxu0 %v1526_v41 }
 0x2d0   :  { %v861_v35 = vadd.f32 %v860_v48, %v859_v18  ;;  %v68_v18 = vld [vmem:[%s2553_s3 + $0x8] sm:$0xff] }
 0x2d2   :  { %v863_v44 = vadd.f32 %v862_v27, %v861_v35  ;;  %1463 = vmatpush3.bf16.msra.mxu0 %v2419_v15  ;;  %v69_v35 = vpack.c.bf16 %v68_v18, %v67_v33 }
 0x2d3   :  { %1468 = vmatprep.subr.bf16.mxu0 %v1526_v41 }
 0x2d4   :  { %v865_v57 = vadd.f32 %v864_v17, %v863_v44 }
 0x2d6   :  { %v867_v24 = vadd.f32 %v866_v9, %v865_v57 }
 0x2d8   :  { %v868_v43 = vrot.slane %v867_v24, 4 }
 0x2da   :  { %v869_v26 = vadd.f32 %v868_v43, %v867_v24 }
 0x2dc   :  { %v870_v36 = vrot.slane %v869_v26, 2 }
 0x2de   :  { %v871_v22 = vadd.f32 %v870_v36, %v869_v26 }
 0x2e0   :  { %v872_v38 = vrot.slane %v871_v22, 1 }
 0x2e2   :  { %v873_v32 = vadd.f32 %v872_v38, %v871_v22 }
 0x2e4   :  { %v874_v28 = vmax.f32 %v873_v32, 1.0 }
 0x2e6   :  { %1524 = vrsqrt.f32 %v874_v28 }
 0x2f3   :  { %v2433_v30 = vpop.eup %1524 }
 0x2f4   :  { %v880_v40 = vmul.f32 %v2433_v30, %v1582_v8 }
 0x2f6   :  { %v881_v20 = vpack.c.bf16 %v880_v40, %v880_v40 }
 0x2f8   :  { %v888_v10 = vsel %vm886_vm13, %v881_v20, 0 }
 0x2f9   :  { %1451 = vmatpush3.bf16.msra.mxu1 %v888_v10  ;;  %v71_v10 = vpack.c.bf16 %v70_v39, %v70_v39 }
 0x2fa   :  { %1474 = vmatprep.subr.bf16.mxu1 %v1526_v41 }
 0x2fc   :  { %1453 = vmatmul.mubr.msk.bf16.vlgmr.msra.gmra.mxu1 %vm882_vm14, %v63_v31 }
 0x2fd   :  { %1475 = vmatpush3.bf16.msra.mxu1 %v2405_v56  ;;  %1482 = vmatprep.mubr.msk.bf16.mxu1 %vm2572_vm1, %v1526_v41 }
 0x2fe   :  { %1476 = vmatprep.subr.bf16.mxu1 %v1526_v41 }
 0x301   :  { %1477 = vmatpush3.bf16.msra.mxu1 %v2407_v53 }
 0x302   :  { %1478 = vmatprep.subr.bf16.mxu1 %v1526_v41 }
 0x305   :  { %1479 = vmatpush3.bf16.msra.mxu1 %v2415_v4 }
 0x306   :  { %1480 = vmatprep.subr.bf16.mxu1 %v1526_v41 }
 0x309   :  { %1481 = vmatpush3.bf16.msra.mxu1 %v2419_v15 }
 0x30a   :  { %1504 = vmatprep.subr.bf16.mxu1 %v1526_v41 }
 0x3bc   :  { %v924_v25 = vpop.f32.mrf.mxu1 }
 0x3be   :  { %v1454_v34 = vpop.f32.mrf.mxu1 }
 0x3c0   :  { %v927_v47 = vpop.f32.mrf.mxu1 }
 0x3c1   :  { %v931_v49 = vpack.c.bf16 %v927_v47, %v924_v25 }
 0x3c2   :  { %v1455_v21 = vpop.f32.mrf.mxu1 }
 0x3c3   :  { %1465 = vmatmul.mubr.msk.bf16.vlgmr.msra.gmra.mxu0 %vm311_vm2, %v931_v49 }
 0x3c4   :  { %1470 = vmatprep.mubr.msk.bf16.mxu0 %vm2572_vm1, %v1526_v41 }
 0x483   :  { %v969_v50 = vpop.f32.mrf.mxu0 }
 0x484   :  { %v976_v62 = vmul.f32 %v2433_v30, %v969_v50 }
 0x485   :  { %v1466_v37 = vpop.f32.mrf.mxu0 }
 0x486   :  { %v978_v58 = vmax.f32 %v976_v62, 0.0 }
 0x487   :  { %v972_v6 = vpop.f32.mrf.mxu0 }
 0x488   :  { %v977_v29 = vmul.f32 %v2433_v30, %v972_v6  ;;  %v980_v51 = vmul.f32 %v2433_v30, %v978_v58 }
 0x489   :  { %v1467_v13 = vpop.f32.mrf.mxu0 }
 0x48a   :  { %v979_v23 = vmax.f32 %v977_v29, 0.0 }
 0x48c   :  { %v981_v52 = vmul.f32 %v2433_v30, %v979_v23 }
 0x48e   :  { %v982_v63 = vpack.c.bf16 %v981_v52, %v980_v51 }
 0x490   :  { %1469 = vmatpush3.bf16.msra.mxu0 %v982_v63 }
 0x491   :  { %1486 = vmatprep.subr.bf16.mxu0 %v1526_v41 }
 0x493   :  { %1471 = vmatmul.mubr.msk.bf16.vlgmr.msra.gmra.mxu0 %vm983_vm3, %v66_v14 }
 0x494   :  { %1488 = vmatprep.mubr.msk.bf16.mxu0 %vm2572_vm1, %v1526_v41 }
 0x553   :  { %v1021_v12 = vpop.f32.mrf.mxu0 }
 0x555   :  { %v1472_v54 = vpop.f32.mrf.mxu0 }
 0x557   :  { %v1024_v55 = vpop.f32.mrf.mxu0 }
 0x558   :  { %v1028_v19 = vpack.c.bf16 %v1024_v55, %v1021_v12 }
 0x559   :  { %v1473_v5 = vpop.f32.mrf.mxu0 }
 0x55a   :  { %1483 = vmatmul.mubr.msk.bf16.vlgmr.msra.gmra.mxu1 %vm311_vm2, %v1028_v19 }
 0x55b   :  { %1506 = vmatprep.mubr.msk.bf16.mxu1 %vm2572_vm1, %v1526_v41 }
 0x61a   :  { %v1066_v7 = vpop.f32.mrf.mxu1 }
 0x61b   :  { %v1073_v2 = vmul.f32 %v2433_v30, %v1066_v7 }
 0x61c   :  { %v1484_v3 = vpop.f32.mrf.mxu1 }
 0x61d   :  { %v1075_v46 = vmax.f32 %v1073_v2, 0.0 }
 0x61e   :  { %v1069_v61 = vpop.f32.mrf.mxu1 }
 0x61f   :  { %v1074_v0 = vmul.f32 %v2433_v30, %v1069_v61  ;;  %v1077_v11 = vmul.f32 %v2433_v30, %v1075_v46 }
 0x620   :  { %v1485_v60 = vpop.f32.mrf.mxu1 }
 0x621   :  { %v1076_v45 = vmax.f32 %v1074_v0, 0.0 }
 0x623   :  { %v1078_v59 = vmul.f32 %v2433_v30, %v1076_v45 }
 0x625   :  { %v1079_v48 = vpack.c.bf16 %v1078_v59, %v1077_v11 }
 0x627   :  { %1487 = vmatpush3.bf16.msra.mxu0 %v1079_v48 }
 0x628   :  { %1492 = vmatprep.subr.bf16.mxu0 %v1526_v41 }
 0x62a   :  { %1489 = vmatmul.mubr.msk.bf16.vlgmr.msra.gmra.mxu0 %vm983_vm3, %v69_v35 }
 0x62b   :  { %1493 = vmatpush3.bf16.msra.mxu0 %v2405_v56  ;;  %1500 = vmatprep.mubr.msk.bf16.mxu0 %vm2572_vm1, %v1526_v41 }
 0x62c   :  { %1494 = vmatprep.subr.bf16.mxu0 %v1526_v41 }
 0x62f   :  { %1495 = vmatpush3.bf16.msra.mxu0 %v2407_v53 }
 0x630   :  { %1496 = vmatprep.subr.bf16.mxu0 %v1526_v41 }
 0x633   :  { %1497 = vmatpush3.bf16.msra.mxu0 %v2415_v4 }
 0x634   :  { %1498 = vmatprep.subr.bf16.mxu0 %v1526_v41 }
 0x637   :  { %1499 = vmatpush3.bf16.msra.mxu0 %v2419_v15 }
 0x6ea   :  { %v1117_v27 = vpop.f32.mrf.mxu0 }
 0x6ec   :  { %v1490_v44 = vpop.f32.mrf.mxu0 }
 0x6ee   :  { %v1120_v17 = vpop.f32.mrf.mxu0 }
 0x6ef   :  { %v1124_v57 = vpack.c.bf16 %v1120_v17, %v1117_v27 }
 0x6f0   :  { %v1491_v9 = vpop.f32.mrf.mxu0 }
 0x6f1   :  { %1501 = vmatmul.mubr.msk.bf16.vlgmr.msra.gmra.mxu0 %vm311_vm2, %v1124_v57 }
 0x7b1   :  { %v1162_v24 = vpop.f32.mrf.mxu0 }
 0x7b2   :  { %v1169_v43 = vmul.f32 %v2433_v30, %v1162_v24 }
 0x7b3   :  { %v1502_v26 = vpop.f32.mrf.mxu0 }
 0x7b4   :  { %v1171_v22 = vmax.f32 %v1169_v43, 0.0 }
 0x7b5   :  { %v1165_v36 = vpop.f32.mrf.mxu0 }
 0x7b6   :  { %v1170_v38 = vmul.f32 %v2433_v30, %v1165_v36  ;;  %v1173_v40 = vmul.f32 %v2433_v30, %v1171_v22 }
 0x7b7   :  { %v1503_v32 = vpop.f32.mrf.mxu0 }
 0x7b8   :  { %v1172_v28 = vmax.f32 %v1170_v38, 0.0 }
 0x7ba   :  { %v1174_v42 = vmul.f32 %v2433_v30, %v1172_v28 }
 0x7bc   :  { %v1175_v20 = vpack.c.bf16 %v1174_v42, %v1173_v40 }
 0x7be   :  { %1505 = vmatpush3.bf16.msra.mxu1 %v1175_v20 }
 0x7bf   :  { %1510 = vmatprep.subr.bf16.mxu1 %v1526_v41 }
 0x7c1   :  { %1507 = vmatmul.mubr.msk.bf16.vlgmr.msra.gmra.mxu1 %vm983_vm3, %v71_v10 }
 0x7c2   :  { %1511 = vmatpush3.bf16.msra.mxu1 %v2405_v56  ;;  %1518 = vmatprep.mubr.msk.bf16.mxu1 %vm2572_vm1, %v1526_v41 }
 0x7c3   :  { %1512 = vmatprep.subr.bf16.mxu1 %v1526_v41 }
 0x7c6   :  { %1513 = vmatpush3.bf16.msra.mxu1 %v2407_v53 }
 0x7c7   :  { %1514 = vmatprep.subr.bf16.mxu1 %v1526_v41 }
 0x7ca   :  { %1515 = vmatpush3.bf16.msra.mxu1 %v2415_v4 }
 0x7cb   :  { %1516 = vmatprep.subr.bf16.mxu1 %v1526_v41 }
 0x7ce   :  { %1517 = vmatpush3.bf16.msra.mxu1 %v2419_v15 }
 0x881   :  { %v1213_v31 = vpop.f32.mrf.mxu1 }
 0x882   :  { %v1219_v25 = vpack.c.bf16 %v1213_v31, %v1213_v31 }
 0x883   :  { %v1508_v34 = vpop.f32.mrf.mxu1 }
 0x884   :  { %1519 = vmatmul.mubr.msk.bf16.vlgmr.msra.gmra.mxu1 %vm311_vm2, %v1219_v25 }
 0x885   :  { %v1216_v56 = vpop.f32.mrf.mxu1 }
 0x887   :  { %v1509_v47 = vpop.f32.mrf.mxu1 }
 0x944   :  { %v1257_v49 = vpop.f32.mrf.mxu1 }
 0x945   :  { %v1263_v21 = vmul.f32 %v2433_v30, %v1257_v49 }
 0x946   :  { %v1520_v50 = vpop.f32.mrf.mxu1 }
 0x947   :  { %v1264_v53 = vmul.f32 0.0001, %v1263_v21 }
 0x948   :  { %v1260_v62 = vpop.f32.mrf.mxu1 }
 0x949   :  { %v1265_v37 = vadd.f32 %v1264_v53, %v1582_v8 }
 0x94a   :  { %v1521_v4 = vpop.f32.mrf.mxu1 }
 0x94b   :  { %1266 = vxpose.xlu0.b32.start.end [1/1] (short) (narrow) %v1265_v37, 64 }
 0x9c7   :  { %v1282_v41 = vpop.trf.xlu0 }
 0x9c8   :  { %1298 = vst.msk [vmem:[%s2555_s5] sm:$0xff] %vm882_vm14, %v1282_v41 }
 0x9cb   :  { %v1283_v15 = vpop.trf.xlu0 }
 0x9cc   :  { %1299 = vst.msk [vmem:[%s2555_s5 + $0x8] sm:$0xff] %vm882_vm14, %v1283_v15 }
 0x9cf   :  { %v1284_v30 = vpop.trf.xlu0 }
 0x9d0   :  { %1300 = vst.msk [vmem:[%s2555_s5 + $0x10] sm:$0xff] %vm882_vm14, %v1284_v30 }
 0x9d3   :  { %v1285_v8 = vpop.trf.xlu0 }
 0x9d4   :  { %1301 = vst.msk [vmem:[%s2555_s5 + $0x18] sm:$0xff] %vm882_vm14, %v1285_v8 }
 0x9d7   :  { %v1286_v6 = vpop.trf.xlu0 }
 0x9d8   :  { %1302 = vst.msk [vmem:[%s2555_s5 + $0x20] sm:$0xff] %vm882_vm14, %v1286_v6 }
 0x9db   :  { %v1287_v58 = vpop.trf.xlu0 }
 0x9dc   :  { %1303 = vst.msk [vmem:[%s2555_s5 + $0x28] sm:$0xff] %vm882_vm14, %v1287_v58 }
 0x9df   :  { %v1288_v29 = vpop.trf.xlu0 }
 0x9e0   :  { %1304 = vst.msk [vmem:[%s2555_s5 + $0x30] sm:$0xff] %vm882_vm14, %v1288_v29 }
 0x9e3   :  { %v1289_v13 = vpop.trf.xlu0 }
 0x9e4   :  { %1305 = vst.msk [vmem:[%s2555_s5 + $0x38] sm:$0xff] %vm882_vm14, %v1289_v13 }

</bundles_post_ra>
